<compile_context>
chip_gen: v6e
topology: v6e:2x2x1
jax: 0.10.0
libtpu: 0.0.40
codegen_flags: <defaults>
</compile_context>

<pallas_src>
import functools

import jax
import jax.numpy as jnp
from jax import lax
from jax.experimental import pallas as pl
from jax.experimental.pallas import tpu as pltpu


# ----------------------------------------------------------------------------
# Fused kernel (one grid step == one graph)
# ----------------------------------------------------------------------------
def _optimnet_fused_kernel(row_l_ref, col_l_ref, row_s_ref, ew_ref, x_ref,
                           w1_ref, b1_ref, wab_ref, w2_ref, b2_ref, bm_ref,
                           o_ref):
    f32 = jnp.float32
    bf16 = jnp.bfloat16
    n = x_ref.shape[0]
    e = ew_ref.shape[1]

    row_l = row_l_ref[...]            # (1, E) int32  source node per edge
    col_l = col_l_ref[...]            # (1, E) int32  target node per edge
    row_s = row_s_ref[...]            # (E, 1) int32  source node per edge
    ew = ew_ref[...]                  # (1, E) f32    edge weights (lane-major)

    node_ne = lax.broadcasted_iota(jnp.int32, (n, e), 0)   # node id on sublanes
    node_en = lax.broadcasted_iota(jnp.int32, (e, n), 1)   # node id on lanes

    # In-kernel one-hot selectors (no E x N HBM traffic).
    tgt_sel = jnp.where(node_ne == col_l, 1.0, 0.0)                 # (N,E) 1[col_k==c]
    src_sel = jnp.where(node_ne == row_l, 1.0, 0.0)                 # (N,E) 1[row_k==r]
    gat_sel = jnp.where(node_en == row_s, 1.0, 0.0).astype(bf16)    # (E,N) 1[row_k==r]

    def gcn_conv(zw, ew_lane):
        """GCN-normalized aggregation of zw (N,F) with edge weights ew_lane (1,E).

        out = dinv * ((St*ew) @ (T @ (dinv*zw))) + dinv^2 * zw
        (symmetric D^-1/2 normalization with one unit self-loop per node;
        never materializes the N x N adjacency)."""
        deg = jnp.sum(tgt_sel * ew_lane, axis=1, keepdims=True) + 1.0     # (N,1)
        dinv = lax.rsqrt(deg)                                             # (N,1)
        z = dinv * zw                                                     # (N,F) f32
        gath = jnp.dot(gat_sel, z.astype(bf16),
                       preferred_element_type=f32)                        # (E,F) z[row_k]
        wsel = (tgt_sel * ew_lane).astype(bf16)                           # (N,E)
        scat = jnp.dot(wsel, gath.astype(bf16),
                       preferred_element_type=f32)                        # (N,F)
        return dinv * (scat + z)          # = dinv*scat + dinv^2*zw

    # ---- conv1 + ReLU (bf16 matmuls, f32 accumulate) ----
    xw = jnp.dot(x_ref[...], w1_ref[...], preferred_element_type=f32)     # (N,512)
    h = jnp.maximum(gcn_conv(xw, ew) + b1_ref[...], 0.0)                  # (N,512)
    h_bf = h.astype(bf16)

    # ---- similarity1: relu(Wm_a @ h[row] + Wm_b @ h[col] + bm), lane-major edges ----
    uv = jnp.dot(h_bf, wab_ref[...], preferred_element_type=f32)          # (N,2)
    u = uv[:, 0:1]
    v = uv[:, 1:2]
    u_row = jnp.sum(src_sel * u, axis=0, keepdims=True)                   # (1,E) u[row_k]
    v_col = jnp.sum(tgt_sel * v, axis=0, keepdims=True)                   # (1,E) v[col_k]
    new_ew = jnp.maximum(u_row + v_col + bm_ref[0, 0], 0.0)               # (1,E)

    # ---- conv2 ----
    hw = jnp.dot(h_bf, w2_ref[...], preferred_element_type=f32)           # (N,128)
    o_ref[...] = (gcn_conv(hw, new_ew) + b2_ref[...]).astype(o_ref.dtype)


# ----------------------------------------------------------------------------
# Batched wrapper: grid over graphs, weights VMEM-resident across the batch
# ----------------------------------------------------------------------------
def optim_net_forward_batched(params, node_attr, edge_attr, edge_index):
    """node_attr (B,N,F), edge_attr (B,E) or (B,E,1), edge_index (B,2,E)."""
    b, n, f_in = node_attr.shape
    e = edge_index.shape[-1]
    f_hid = params["w1"].shape[1]
    f_out = params["w2"].shape[1]

    # TODO(synk): assumes edge_index has no duplicate edges / pre-existing
    # self-loops (add_remaining_self_loops dedup is not replicated).
    row = edge_index[:, 0, :].astype(jnp.int32)
    col = edge_index[:, 1, :].astype(jnp.int32)
    row_l = row.reshape(b, 1, e)
    col_l = col.reshape(b, 1, e)
    row_s = row.reshape(b, e, 1)
    ew = edge_attr.reshape(b, 1, e).astype(jnp.float32)

    x = node_attr.astype(jnp.bfloat16)
    w1 = params["w1"].astype(jnp.bfloat16)
    w2 = params["w2"].astype(jnp.bfloat16)
    wab = params["wab"].astype(jnp.bfloat16)
    b1 = params["b1"].reshape(1, f_hid).astype(jnp.float32)
    b2 = params["b2"].reshape(1, f_out).astype(jnp.float32)
    bm = params["bm"].reshape(1, 1).astype(jnp.float32)

    flops = 2 * b * (n * f_in * f_hid              # x @ W1
                     + 2 * e * n * f_hid           # conv1 gather + scatter
                     + n * f_hid * 2               # similarity scores
                     + n * f_hid * f_out           # h @ W2
                     + 2 * e * n * f_out           # conv2 gather + scatter
                     + 6 * n * e)                  # selector builds / reduces
    bytes_accessed = (2 * (w1.size + w2.size + wab.size + x.size)
                      + 4 * (b1.size + b2.size + ew.size + b * n * f_out
                             + 3 * b * e + 1))

    per_graph = lambda i: (i, 0, 0)
    const2d = lambda i: (0, 0)
    in_specs = [
        pl.BlockSpec((None, 1, e), per_graph),        # row (lane-major)
        pl.BlockSpec((None, 1, e), per_graph),        # col (lane-major)
        pl.BlockSpec((None, e, 1), per_graph),        # row (sublane-major)
        pl.BlockSpec((None, 1, e), per_graph),        # edge weights
        pl.BlockSpec((None, n, f_in), per_graph),     # x (bf16)
        pl.BlockSpec((f_in, f_hid), const2d),         # W1 (bf16, VMEM-resident)
        pl.BlockSpec((1, f_hid), const2d),            # b1
        pl.BlockSpec((f_hid, 2), const2d),            # wab (bf16)
        pl.BlockSpec((f_hid, f_out), const2d),        # W2 (bf16, VMEM-resident)
        pl.BlockSpec((1, f_out), const2d),            # b2
        pl.BlockSpec((1, 1), const2d,
                     memory_space=pltpu.MemorySpace.SMEM),   # bm scalar
    ]

    # TODO(synk): for large graphs (E*N selectors / whole-graph blocks exceeding
    # v7x's 64 MiB VMEM) the per-graph block would need row tiling over N.
    return pl.pallas_call(
        _optimnet_fused_kernel,
        out_shape=jax.ShapeDtypeStruct((b, n, f_out), jnp.float32),
        grid=(b,),
        in_specs=in_specs,
        out_specs=pl.BlockSpec((None, n, f_out), per_graph),
        compiler_params=pltpu.CompilerParams(
            dimension_semantics=("parallel",),
            vmem_limit_bytes=32 * 1024 * 1024),
        cost_estimate=pl.CostEstimate(
            flops=int(flops),
            transcendentals=int(2 * b * n),
            bytes_accessed=int(bytes_accessed)),
    )(row_l, col_l, row_s, ew, x, w1, b1, wab, w2, b2, bm)


# ----------------------------------------------------------------------------
# Single-graph forward (matches optimNet.forward)
# ----------------------------------------------------------------------------
def optim_net_forward(params, node_attr, edge_attr, edge_index, coords, frame):
    del coords, frame  # unused by the reference forward
    out = optim_net_forward_batched(
        params, node_attr[None], edge_attr.reshape(1, -1), edge_index[None])
    return out[0]


# ----------------------------------------------------------------------------
# Pure-JAX f32 reference (torch_geometric GCNConv semantics) for validation
# ----------------------------------------------------------------------------
def _reference_forward(params, node_attr, edge_attr, edge_index):
    n = node_attr.shape[0]
    row, col = edge_index[0], edge_index[1]
    ew = edge_attr.reshape(-1).astype(jnp.float32)
    w1 = params["w1"].astype(jnp.float32)
    w2 = params["w2"].astype(jnp.float32)
    wab = params["wab"].astype(jnp.float32)

    def gcn(x, w, bias, weights):
        xw = x @ w
        deg = jnp.zeros((n,), jnp.float32).at[col].add(weights) + 1.0
        dinv = 1.0 / jnp.sqrt(deg)
        norm = dinv[row] * weights * dinv[col]
        out = jnp.zeros_like(xw).at[col].add(norm[:, None] * xw[row])
        out = out + (dinv * dinv)[:, None] * xw
        return out + bias

    h = jax.nn.relu(gcn(node_attr.astype(jnp.float32), w1, params["b1"], ew))
    uv = h @ wab
    new_ew = jax.nn.relu(uv[row, 0] + uv[col, 1] + params["bm"])
    return gcn(h, w2, params["b2"], new_ew)


# ----------------------------------------------------------------------------
# Deterministic parameter init (shapes from optimNet.__init__)
# ----------------------------------------------------------------------------
def init_params(key):
    k1, k2, k3 = jax.random.split(key, 3)

    def glorot(k, fan_in, fan_out):
        limit = jnp.sqrt(6.0 / (fan_in + fan_out))
        # stored as (in, out), i.e. the transpose of PyTorch's (out, in) weight
        return jax.random.uniform(k, (fan_in, fan_out), jnp.float32, -limit, limit)

    w1 = glorot(k1, 512, 512).astype(jnp.bfloat16)   # GCNConv(512, 512).lin
    b1 = jnp.zeros((512,), jnp.float32)
    w2 = glorot(k2, 512, 128).astype(jnp.bfloat16)   # GCNConv(512, 128).lin
    b2 = jnp.zeros((128,), jnp.float32)
    wm = glorot(k3, 1024, 1).reshape(1024)           # nn.Linear(1024, 1).weight
    bm = jnp.zeros((), jnp.float32)                  # nn.Linear(1024, 1).bias
    # split the 1024-wide MLP weight into (source-half, target-half) columns
    wab = jnp.stack([wm[:512], wm[512:]], axis=1)    # (512, 2)
    return {"w1": w1, "b1": b1, "w2": w2, "b2": b2, "wab": wab, "bm": bm}


if __name__ == "__main__":
    key = jax.random.PRNGKey(0)
    k_par, k_x, k_ew, k_row, k_off, k_xb = jax.random.split(key, 6)

    N, E, F_IN = 16, 32, 512
    params = init_params(k_par)

    node_attr = jax.random.normal(k_x, (N, F_IN), jnp.float32)
    edge_attr = jax.random.uniform(k_ew, (E, 1), jnp.float32, 0.5, 1.5)

    # random edges with no self-loops (col guaranteed != row)
    row = jax.random.randint(k_row, (E,), 0, N, dtype=jnp.int32)
    off = jax.random.randint(k_off, (E,), 1, N, dtype=jnp.int32)
    col = (row + off) % N
    edge_index = jnp.stack([row, col], axis=0)

    coords = jnp.zeros((N, 3), jnp.float32)   # unused in forward
    frame = jnp.zeros((), jnp.float32)        # unused in forward

    # --- single-graph forward (matches optimNet.forward) ---
    fwd = jax.jit(functools.partial(optim_net_forward, params))
    out = jax.block_until_ready(fwd(node_attr, edge_attr, edge_index, coords, frame))
    assert out.shape == (N, 128) and out.dtype == jnp.float32
    assert bool(jnp.all(jnp.isfinite(out)))

    ref = _reference_forward(params, node_attr, edge_attr, edge_index)
    max_err = float(jnp.max(jnp.abs(out - ref)))
    assert bool(jnp.allclose(out, ref, atol=1e-1, rtol=1e-1)), max_err

    # --- batched forward: grid=(B,) with VMEM-resident weights ---
    B = 4
    node_attr_b = jax.random.normal(k_xb, (B, N, F_IN), jnp.float32)
    edge_attr_b = jnp.broadcast_to(edge_attr.reshape(1, E), (B, E))
    edge_index_b = jnp.broadcast_to(edge_index[None], (B, 2, E))
    fwd_b = jax.jit(functools.partial(optim_net_forward_batched, params))
    out_b = jax.block_until_ready(fwd_b(node_attr_b, edge_attr_b, edge_index_b))
    assert out_b.shape == (B, N, 128)
    assert bool(jnp.all(jnp.isfinite(out_b)))

    print("KERNEL_OK")
</pallas_src>

<mosaic_0001>
module attributes {stable_mosaic.version = 11 : i64} {
  func.func @_optimnet_fused_kernel(%arg0: i32, %arg1: memref<1x1x32xi32, #tpu.memory_space<vmem>>, %arg2: memref<1x1x32xi32, #tpu.memory_space<vmem>>, %arg3: memref<1x32x1xi32, #tpu.memory_space<vmem>>, %arg4: memref<1x1x32xf32, #tpu.memory_space<vmem>>, %arg5: memref<1x16x512xbf16, #tpu.memory_space<vmem>>, %arg6: memref<512x512xbf16, #tpu.memory_space<vmem>>, %arg7: memref<1x512xf32, #tpu.memory_space<vmem>>, %arg8: memref<512x2xbf16, #tpu.memory_space<vmem>>, %arg9: memref<512x128xbf16, #tpu.memory_space<vmem>>, %arg10: memref<1x128xf32, #tpu.memory_space<vmem>>, %arg11: memref<1x1xf32, #tpu.memory_space<smem>>, %arg12: memref<1x16x128xf32, #tpu.memory_space<vmem>>) attributes {dimension_semantics = [#tpu.dimension_semantics<parallel>], iteration_bounds = array<i64: 1>, scalar_prefetch = 0 : i64, scratch_operands = 0 : i64, tpu.core_type = #tpu.core_type<tc>, window_params = [{transform_indices = @transform_0, window_bounds = array<i64: 1, 1, 32>}, {transform_indices = @transform_1, window_bounds = array<i64: 1, 1, 32>}, {transform_indices = @transform_2, window_bounds = array<i64: 1, 32, 1>}, {transform_indices = @transform_3, window_bounds = array<i64: 1, 1, 32>}, {transform_indices = @transform_4, window_bounds = array<i64: 1, 16, 512>}, {pipeline_mode = #tpu.pipeline_mode<synchronous>, transform_indices = @transform_5, window_bounds = array<i64: 512, 512>}, {pipeline_mode = #tpu.pipeline_mode<synchronous>, transform_indices = @transform_6, window_bounds = array<i64: 1, 512>}, {pipeline_mode = #tpu.pipeline_mode<synchronous>, transform_indices = @transform_7, window_bounds = array<i64: 512, 2>}, {pipeline_mode = #tpu.pipeline_mode<synchronous>, transform_indices = @transform_8, window_bounds = array<i64: 512, 128>}, {pipeline_mode = #tpu.pipeline_mode<synchronous>, transform_indices = @transform_9, window_bounds = array<i64: 1, 128>}, {transform_indices = @transform_10, window_bounds = array<i64: 1, 1>}, {transform_indices = @transform_11, window_bounds = array<i64: 1, 16, 128>}]} {
    %c0 = arith.constant 0 : index
    %c0_0 = arith.constant 0 : index
    %c0_1 = arith.constant 0 : index
    %0 = vector.load %arg1[%c0, %c0_0, %c0_1] : memref<1x1x32xi32, #tpu.memory_space<vmem>>, vector<1x1x32xi32>
    %1 = vector.shape_cast %0 : vector<1x1x32xi32> to vector<1x32xi32>
    %c0_2 = arith.constant 0 : index
    %c0_3 = arith.constant 0 : index
    %c0_4 = arith.constant 0 : index
    %2 = vector.load %arg2[%c0_2, %c0_3, %c0_4] : memref<1x1x32xi32, #tpu.memory_space<vmem>>, vector<1x1x32xi32>
    %3 = vector.shape_cast %2 : vector<1x1x32xi32> to vector<1x32xi32>
    %c0_5 = arith.constant 0 : index
    %c0_6 = arith.constant 0 : index
    %c0_7 = arith.constant 0 : index
    %4 = vector.load %arg3[%c0_5, %c0_6, %c0_7] : memref<1x32x1xi32, #tpu.memory_space<vmem>>, vector<1x32x1xi32>
    %5 = vector.shape_cast %4 : vector<1x32x1xi32> to vector<32x1xi32>
    %c0_8 = arith.constant 0 : index
    %c0_9 = arith.constant 0 : index
    %c0_10 = arith.constant 0 : index
    %6 = vector.load %arg4[%c0_8, %c0_9, %c0_10] : memref<1x1x32xf32, #tpu.memory_space<vmem>>, vector<1x1x32xf32>
    %7 = vector.shape_cast %6 : vector<1x1x32xf32> to vector<1x32xf32>
    %8 = tpu.iota {dimensions = array<i32: 0>} : vector<16x32xi32>
    %9 = tpu.iota {dimensions = array<i32: 1>} : vector<32x16xi32>
    %10 = vector.broadcast %3 : vector<1x32xi32> to vector<16x32xi32>
    %11 = arith.cmpi eq, %8, %10 : vector<16x32xi32>
    %cst = arith.constant 1.000000e+00 : f32
    %cst_11 = arith.constant 0.000000e+00 : f32
    %12 = vector.broadcast %cst : f32 to vector<16x32xf32>
    %13 = vector.broadcast %cst_11 : f32 to vector<16x32xf32>
    %14 = arith.select %11, %12, %13 : vector<16x32xi1>, vector<16x32xf32>
    %15 = vector.broadcast %1 : vector<1x32xi32> to vector<16x32xi32>
    %16 = arith.cmpi eq, %8, %15 : vector<16x32xi32>
    %cst_12 = arith.constant 1.000000e+00 : f32
    %cst_13 = arith.constant 0.000000e+00 : f32
    %17 = vector.broadcast %cst_12 : f32 to vector<16x32xf32>
    %18 = vector.broadcast %cst_13 : f32 to vector<16x32xf32>
    %19 = arith.select %16, %17, %18 : vector<16x32xi1>, vector<16x32xf32>
    %20 = vector.broadcast %5 : vector<32x1xi32> to vector<32x16xi32>
    %21 = arith.cmpi eq, %9, %20 : vector<32x16xi32>
    %cst_14 = arith.constant 1.000000e+00 : f32
    %cst_15 = arith.constant 0.000000e+00 : f32
    %22 = vector.broadcast %cst_14 : f32 to vector<32x16xf32>
    %23 = vector.broadcast %cst_15 : f32 to vector<32x16xf32>
    %24 = arith.select %21, %22, %23 : vector<32x16xi1>, vector<32x16xf32>
    %25 = arith.truncf %24 : vector<32x16xf32> to vector<32x16xbf16>
    %c0_16 = arith.constant 0 : index
    %c0_17 = arith.constant 0 : index
    %c0_18 = arith.constant 0 : index
    %26 = vector.load %arg5[%c0_16, %c0_17, %c0_18] : memref<1x16x512xbf16, #tpu.memory_space<vmem>>, vector<1x16x512xbf16>
    %27 = vector.shape_cast %26 : vector<1x16x512xbf16> to vector<16x512xbf16>
    %c0_19 = arith.constant 0 : index
    %c0_20 = arith.constant 0 : index
    %28 = vector.load %arg6[%c0_19, %c0_20] : memref<512x512xbf16, #tpu.memory_space<vmem>>, vector<512x512xbf16>
    %cst_21 = arith.constant dense<0.000000e+00> : vector<16x512xf32>
    %29 = tpu.matmul %27, %28, %cst_21 {dimension_numbers = #tpu.dot_dimension_numbers<[1], [0], [0], [1], [0, 0, 1, 1], [], []>} : vector<16x512xbf16>, vector<512x512xbf16>, vector<16x512xf32> -> vector<16x512xf32>
    %30 = vector.broadcast %7 : vector<1x32xf32> to vector<16x32xf32>
    %31 = arith.mulf %14, %30 : vector<16x32xf32>
    %cst_22 = arith.constant dense<0.000000e+00> : vector<16xf32>
    %32 = vector.multi_reduction <add>, %31, %cst_22 [1] : vector<16x32xf32> to vector<16xf32>
    %33 = vector.shape_cast %32 : vector<16xf32> to vector<16x1xf32>
    %cst_23 = arith.constant 1.000000e+00 : f32
    %34 = vector.broadcast %cst_23 : f32 to vector<16x1xf32>
    %35 = arith.addf %33, %34 : vector<16x1xf32>
    %36 = math.rsqrt %35 : vector<16x1xf32>
    %37 = vector.broadcast %36 : vector<16x1xf32> to vector<16x512xf32>
    %38 = arith.mulf %37, %29 : vector<16x512xf32>
    %39 = arith.truncf %38 : vector<16x512xf32> to vector<16x512xbf16>
    %cst_24 = arith.constant dense<0.000000e+00> : vector<32x512xf32>
    %40 = tpu.matmul %25, %39, %cst_24 {dimension_numbers = #tpu.dot_dimension_numbers<[1], [0], [0], [1], [0, 0, 1, 1], [], []>} : vector<32x16xbf16>, vector<16x512xbf16>, vector<32x512xf32> -> vector<32x512xf32>
    %41 = vector.broadcast %7 : vector<1x32xf32> to vector<16x32xf32>
    %42 = arith.mulf %14, %41 : vector<16x32xf32>
    %43 = arith.truncf %42 : vector<16x32xf32> to vector<16x32xbf16>
    %44 = arith.truncf %40 : vector<32x512xf32> to vector<32x512xbf16>
    %cst_25 = arith.constant dense<0.000000e+00> : vector<16x512xf32>
    %45 = tpu.matmul %43, %44, %cst_25 {dimension_numbers = #tpu.dot_dimension_numbers<[1], [0], [0], [1], [0, 0, 1, 1], [], []>} : vector<16x32xbf16>, vector<32x512xbf16>, vector<16x512xf32> -> vector<16x512xf32>
    %46 = arith.addf %45, %38 : vector<16x512xf32>
    %47 = vector.broadcast %36 : vector<16x1xf32> to vector<16x512xf32>
    %48 = arith.mulf %47, %46 : vector<16x512xf32>
    %c0_26 = arith.constant 0 : index
    %c0_27 = arith.constant 0 : index
    %49 = vector.load %arg7[%c0_26, %c0_27] : memref<1x512xf32, #tpu.memory_space<vmem>>, vector<1x512xf32>
    %50 = vector.broadcast %49 : vector<1x512xf32> to vector<16x512xf32>
    %51 = arith.addf %48, %50 : vector<16x512xf32>
    %cst_28 = arith.constant 0.000000e+00 : f32
    %52 = vector.broadcast %cst_28 : f32 to vector<16x512xf32>
    %53 = arith.maximumf %51, %52 : vector<16x512xf32>
    %54 = arith.truncf %53 : vector<16x512xf32> to vector<16x512xbf16>
    %c0_29 = arith.constant 0 : index
    %c0_30 = arith.constant 0 : index
    %55 = vector.load %arg8[%c0_29, %c0_30] : memref<512x2xbf16, #tpu.memory_space<vmem>>, vector<512x2xbf16>
    %cst_31 = arith.constant dense<0.000000e+00> : vector<16x2xf32>
    %56 = tpu.matmul %54, %55, %cst_31 {dimension_numbers = #tpu.dot_dimension_numbers<[1], [0], [0], [1], [0, 0, 1, 1], [], []>} : vector<16x512xbf16>, vector<512x2xbf16>, vector<16x2xf32> -> vector<16x2xf32>
    %57 = vector.extract_strided_slice %56 {offsets = [0, 0], sizes = [16, 1], strides = [1, 1]} : vector<16x2xf32> to vector<16x1xf32>
    %58 = vector.extract_strided_slice %56 {offsets = [0, 1], sizes = [16, 1], strides = [1, 1]} : vector<16x2xf32> to vector<16x1xf32>
    %59 = vector.broadcast %57 : vector<16x1xf32> to vector<16x32xf32>
    %60 = arith.mulf %19, %59 : vector<16x32xf32>
    %cst_32 = arith.constant dense<0.000000e+00> : vector<32xf32>
    %61 = vector.multi_reduction <add>, %60, %cst_32 [0] : vector<16x32xf32> to vector<32xf32>
    %62 = vector.shape_cast %61 : vector<32xf32> to vector<1x32xf32>
    %63 = vector.broadcast %58 : vector<16x1xf32> to vector<16x32xf32>
    %64 = arith.mulf %14, %63 : vector<16x32xf32>
    %cst_33 = arith.constant dense<0.000000e+00> : vector<32xf32>
    %65 = vector.multi_reduction <add>, %64, %cst_33 [0] : vector<16x32xf32> to vector<32xf32>
    %66 = vector.shape_cast %65 : vector<32xf32> to vector<1x32xf32>
    %67 = arith.addf %62, %66 : vector<1x32xf32>
    %c0_34 = arith.constant 0 : index
    %c0_35 = arith.constant 0 : index
    %68 = memref.load %arg11[%c0_34, %c0_35] : memref<1x1xf32, #tpu.memory_space<smem>>
    %69 = vector.broadcast %68 : f32 to vector<1x32xf32>
    %70 = arith.addf %67, %69 : vector<1x32xf32>
    %cst_36 = arith.constant 0.000000e+00 : f32
    %71 = vector.broadcast %cst_36 : f32 to vector<1x32xf32>
    %72 = arith.maximumf %70, %71 : vector<1x32xf32>
    %c0_37 = arith.constant 0 : index
    %c0_38 = arith.constant 0 : index
    %73 = vector.load %arg9[%c0_37, %c0_38] : memref<512x128xbf16, #tpu.memory_space<vmem>>, vector<512x128xbf16>
    %cst_39 = arith.constant dense<0.000000e+00> : vector<16x128xf32>
    %74 = tpu.matmul %54, %73, %cst_39 {dimension_numbers = #tpu.dot_dimension_numbers<[1], [0], [0], [1], [0, 0, 1, 1], [], []>} : vector<16x512xbf16>, vector<512x128xbf16>, vector<16x128xf32> -> vector<16x128xf32>
    %75 = vector.broadcast %72 : vector<1x32xf32> to vector<16x32xf32>
    %76 = arith.mulf %14, %75 : vector<16x32xf32>
    %cst_40 = arith.constant dense<0.000000e+00> : vector<16xf32>
    %77 = vector.multi_reduction <add>, %76, %cst_40 [1] : vector<16x32xf32> to vector<16xf32>
    %78 = vector.shape_cast %77 : vector<16xf32> to vector<16x1xf32>
    %cst_41 = arith.constant 1.000000e+00 : f32
    %79 = vector.broadcast %cst_41 : f32 to vector<16x1xf32>
    %80 = arith.addf %78, %79 : vector<16x1xf32>
    %81 = math.rsqrt %80 : vector<16x1xf32>
    %82 = vector.broadcast %81 : vector<16x1xf32> to vector<16x128xf32>
    %83 = arith.mulf %82, %74 : vector<16x128xf32>
    %84 = arith.truncf %83 : vector<16x128xf32> to vector<16x128xbf16>
    %cst_42 = arith.constant dense<0.000000e+00> : vector<32x128xf32>
    %85 = tpu.matmul %25, %84, %cst_42 {dimension_numbers = #tpu.dot_dimension_numbers<[1], [0], [0], [1], [0, 0, 1, 1], [], []>} : vector<32x16xbf16>, vector<16x128xbf16>, vector<32x128xf32> -> vector<32x128xf32>
    %86 = vector.broadcast %72 : vector<1x32xf32> to vector<16x32xf32>
    %87 = arith.mulf %14, %86 : vector<16x32xf32>
    %88 = arith.truncf %87 : vector<16x32xf32> to vector<16x32xbf16>
    %89 = arith.truncf %85 : vector<32x128xf32> to vector<32x128xbf16>
    %cst_43 = arith.constant dense<0.000000e+00> : vector<16x128xf32>
    %90 = tpu.matmul %88, %89, %cst_43 {dimension_numbers = #tpu.dot_dimension_numbers<[1], [0], [0], [1], [0, 0, 1, 1], [], []>} : vector<16x32xbf16>, vector<32x128xbf16>, vector<16x128xf32> -> vector<16x128xf32>
    %91 = arith.addf %90, %83 : vector<16x128xf32>
    %92 = vector.broadcast %81 : vector<16x1xf32> to vector<16x128xf32>
    %93 = arith.mulf %92, %91 : vector<16x128xf32>
    %c0_44 = arith.constant 0 : index
    %c0_45 = arith.constant 0 : index
    %94 = vector.load %arg10[%c0_44, %c0_45] : memref<1x128xf32, #tpu.memory_space<vmem>>, vector<1x128xf32>
    %95 = vector.broadcast %94 : vector<1x128xf32> to vector<16x128xf32>
    %96 = arith.addf %93, %95 : vector<16x128xf32>
    %c0_46 = arith.constant 0 : index
    %c0_47 = arith.constant 0 : index
    %c0_48 = arith.constant 0 : index
    %97 = vector.load %arg12[%c0_46, %c0_47, %c0_48] : memref<1x16x128xf32, #tpu.memory_space<vmem>>, vector<1x16x128xf32>
    %98 = vector.shape_cast %97 : vector<1x16x128xf32> to vector<16x128xf32>
    %99 = vector.shape_cast %96 : vector<16x128xf32> to vector<1x16x128xf32>
    tpu.vector_store %arg12[%c0_46, %c0_47, %c0_48], %99 {strides = array<i32>} : memref<1x16x128xf32, #tpu.memory_space<vmem>>, vector<1x16x128xf32>,
    return
  }
  func.func @transform_0(%arg0: i32) -> (i32, i32, i32) {
    %c0_i32 = arith.constant 0 : i32
    %c0_i32_0 = arith.constant 0 : i32
    %c0_i32_1 = arith.constant 0 : i32
    return %arg0, %c0_i32, %c0_i32_0 : i32, i32, i32
  }
  func.func @transform_1(%arg0: i32) -> (i32, i32, i32) {
    %c0_i32 = arith.constant 0 : i32
    %c0_i32_0 = arith.constant 0 : i32
    %c0_i32_1 = arith.constant 0 : i32
    return %arg0, %c0_i32, %c0_i32_0 : i32, i32, i32
  }
  func.func @transform_2(%arg0: i32) -> (i32, i32, i32) {
    %c0_i32 = arith.constant 0 : i32
    %c0_i32_0 = arith.constant 0 : i32
    %c0_i32_1 = arith.constant 0 : i32
    return %arg0, %c0_i32, %c0_i32_0 : i32, i32, i32
  }
  func.func @transform_3(%arg0: i32) -> (i32, i32, i32) {
    %c0_i32 = arith.constant 0 : i32
    %c0_i32_0 = arith.constant 0 : i32
    %c0_i32_1 = arith.constant 0 : i32
    return %arg0, %c0_i32, %c0_i32_0 : i32, i32, i32
  }
  func.func @transform_4(%arg0: i32) -> (i32, i32, i32) {
    %c0_i32 = arith.constant 0 : i32
    %c0_i32_0 = arith.constant 0 : i32
    %c0_i32_1 = arith.constant 0 : i32
    return %arg0, %c0_i32, %c0_i32_0 : i32, i32, i32
  }
  func.func @transform_5(%arg0: i32) -> (i32, i32) {
    %c0_i32 = arith.constant 0 : i32
    %c0_i32_0 = arith.constant 0 : i32
    %c0_i32_1 = arith.constant 0 : i32
    return %c0_i32, %c0_i32_0 : i32, i32
  }
  func.func @transform_6(%arg0: i32) -> (i32, i32) {
    %c0_i32 = arith.constant 0 : i32
    %c0_i32_0 = arith.constant 0 : i32
    %c0_i32_1 = arith.constant 0 : i32
    return %c0_i32, %c0_i32_0 : i32, i32
  }
  func.func @transform_7(%arg0: i32) -> (i32, i32) {
    %c0_i32 = arith.constant 0 : i32
    %c0_i32_0 = arith.constant 0 : i32
    %c0_i32_1 = arith.constant 0 : i32
    return %c0_i32, %c0_i32_0 : i32, i32
  }
  func.func @transform_8(%arg0: i32) -> (i32, i32) {
    %c0_i32 = arith.constant 0 : i32
    %c0_i32_0 = arith.constant 0 : i32
    %c0_i32_1 = arith.constant 0 : i32
    return %c0_i32, %c0_i32_0 : i32, i32
  }
  func.func @transform_9(%arg0: i32) -> (i32, i32) {
    %c0_i32 = arith.constant 0 : i32
    %c0_i32_0 = arith.constant 0 : i32
    %c0_i32_1 = arith.constant 0 : i32
    return %c0_i32, %c0_i32_0 : i32, i32
  }
  func.func @transform_10(%arg0: i32) -> (i32, i32) {
    %c0_i32 = arith.constant 0 : i32
    %c0_i32_0 = arith.constant 0 : i32
    %c0_i32_1 = arith.constant 0 : i32
    return %c0_i32, %c0_i32_0 : i32, i32
  }
  func.func @transform_11(%arg0: i32) -> (i32, i32, i32) {
    %c0_i32 = arith.constant 0 : i32
    %c0_i32_0 = arith.constant 0 : i32
    %c0_i32_1 = arith.constant 0 : i32
    return %arg0, %c0_i32, %c0_i32_0 : i32, i32, i32
  }
}

</mosaic_0001>

<bundles_post_ra>
// kernel: optim_net_forward.1
= control target key start
LH: loop header
LB: loop body
LE: loop exit
PB: predicated region body
PF: predicated region fallthrough
CT: control target
= control target key end

     0   :  { %17 = vsyncpa [#allocation4], 0  ;;  %s3214_s0 = inlined_call_operand.vmem [shape: s32[1,1,32], index: 0, kind: input, shape index: {}]   ;;  %s3215_s1 = inlined_call_operand.vmem [shape: s32[1,1,32], index: 1, kind: input, shape index: {}]   ;;  %s3216_s2 = inlined_call_operand.vmem [shape: s32[1,32,1], index: 2, kind: input, shape index: {}]   ;;  %s3217_s3 = inlined_call_operand.vmem [shape: f32[1,1,32], index: 3, kind: input, shape index: {}]   ;;  %s3218_s4 = inlined_call_operand.vmem [shape: bf16[1,16,512], index: 4, kind: input, shape index: {}]   ;;  %s3219_s5 = inlined_call_operand.hbm [shape: bf16[512,512], index: 5, kind: input, shape index: {}]   ;;  %s3220_s6 = inlined_call_operand.vmem [shape: f32[1,512], index: 6, kind: input, shape index: {}]   ;;  %s3221_s7 = inlined_call_operand.hbm [shape: bf16[512,2], index: 7, kind: input, shape index: {}]   ;;  %s3222_s8 = inlined_call_operand.hbm [shape: bf16[512,128], index: 8, kind: input, shape index: {}]   ;;  %s3223_s9 = inlined_call_operand.vmem [shape: f32[1,128], index: 9, kind: input, shape index: {}]   ;;  %s3224_s10 = inlined_call_operand.<no memory space> [shape: f32[1,1], index: 10, kind: input, shape index: {}]   ;;  %s3225_s11 = inlined_call_operand.hbm [shape: f32[1,16,128], index: 11, kind: output, shape index: {}]  }
   0x1   :  { %18 = vsyncpa [#allocation7], 0 }
   0x2   :  { %19 = vsyncpa [#allocation5], 0  ;;  %s2944_s17 = smov [#allocation6]  }
   0x3   :  { %s49_s18 = sshll.u32 %s2944_s17, 4  ;;  %s50_s18 = int_to_ptr.vmem [resolvable:$true] %s49_s18 }
   0x4   :  { %s2866_s19 = scalar_lea.vmem %s50_s18, 4096  ;;  %p2871_p1 = scmp.lt.s32.totalorder %s50_s18, %s50_s18 }
   0x5   :  { %p2867_p0 = scmp.ne.s32.totalorder %s50_s18, %s2866_s19  ;;  %p2872_p2 = scmp.lt.s32.totalorder %s2866_s19, %s2866_s19 }
   0x7   :  { %p2873_p3 = por %p2872_p2, %p2871_p1 }
   0x9   :  { %p2874_p4 = pnand %p2873_p3, %p2867_p0 }
   0xb   :  { %2877 = shalt.err (!%p2874_p4)
}
   0xc   :  { %s2945_s20 = smov 64   ;;  %s2946_s21 = smov 4  }
   0xd   :  { %55 = dma.hbm_to_vmem [thread:$0]  %s3221_s7, 4096, %s50_s18, [#allocation7], %s2945_s20, %s2945_s20, %s2946_s21  }
   0xe   :  { %s2947_s24 = smov [#allocation3]  }
   0xf   :  { %s35_s25 = sshll.u32 %s2947_s24, 4  ;;  %s36_s25 = int_to_ptr.vmem [resolvable:$true] %s35_s25 }
  0x10   :  { %s2886_s26 = scalar_lea.vmem %s36_s25, 16384  ;;  %p2891_p6 = scmp.lt.s32.totalorder %s36_s25, %s36_s25 }
  0x11   :  { %p2887_p5 = scmp.ne.s32.totalorder %s36_s25, %s2886_s26  ;;  %p2892_p7 = scmp.lt.s32.totalorder %s2886_s26, %s2886_s26 }
  0x13   :  { %p2893_p8 = por %p2892_p7, %p2891_p6 }
  0x15   :  { %p2894_p9 = pnand %p2893_p8, %p2887_p5 }
  0x17   :  { %2897 = shalt.err (!%p2894_p9)
}
  0x18   :  { %s2948_s27 = smov 256   ;;  %s2949_s28 = smov 16  }
  0x19   :  { %41 = dma.hbm_to_vmem [thread:$0]  %s3219_s5, 16384, %s36_s25, [#allocation4], %s2948_s27, %s2948_s27, %s2949_s28  }
  0x1a   :  { %s2950_s12 = smov [#allocation8]  }
  0x1b   :  { %s61_s13 = sshll.u32 %s2950_s12, 4  ;;  %s62_s13 = int_to_ptr.vmem [resolvable:$true] %s61_s13 }
  0x1c   :  { %s2906_s7 = scalar_lea.vmem %s62_s13, 4096  ;;  %p2911_p11 = scmp.lt.s32.totalorder %s62_s13, %s62_s13 }
  0x1d   :  { %p2907_p10 = scmp.ne.s32.totalorder %s62_s13, %s2906_s7  ;;  %p2912_p12 = scmp.lt.s32.totalorder %s2906_s7, %s2906_s7 }
  0x1f   :  { %p2913_p13 = por %p2912_p12, %p2911_p11 }
  0x21   :  { %p2914_p0 = pnand %p2913_p13, %p2907_p10 }
  0x23   :  { %2917 = shalt.err (!%p2914_p0)
}
  0x24   :  { %67 = dma.hbm_to_vmem [thread:$0]  %s3222_s8, 4096, %s62_s13, [#allocation7], %s2945_s20, %s2945_s20, %s2946_s21  }
  0x25   :  { %2938 = dma.done.wait [#allocation4], 16384  }
  0x26   :  { %2939 = vsyncadd [#allocation4], 4294950912 }
  0x27   :  { %2940 = dma.done.wait [#allocation7], 8192  }
  0x28   :  { %2941 = vsyncadd [#allocation7], 4294959104  ;;  %v2588_v0 = vld [vmem:[#allocation3 + $0xe4] ss:$16 sps:$4 sm:$0xff]   ;;  %v2592_v2 = vld [vmem:[#allocation3 + $0xe0] ss:$16 sps:$4 sm:$0xff]  }
  0x29   :  { %v2590_v1 = vld [vmem:[#allocation3 + $0x2e4] ss:$16 sps:$4 sm:$0xff]   ;;  %924 = vmatprep.subr.bf16.mxu0 %v2588_v0  ;;  %v2593_v3 = vld [vmem:[#allocation3 + $0x2e0] ss:$16 sps:$4 sm:$0xff]   ;;  %v2951_v8 = vmov 0   ;;  %vm1104_vm1 = vcmask 261120  }
  0x2a   :  { %967 = vmatprep.subr.bf16.mxu1 %v2590_v1  ;;  %v2594_v4 = vld [vmem:[#allocation3 + $0xc4] ss:$16 sps:$4 sm:$0xff]   ;;  %925 = vmatpush1.bf16.msra.mxu0 %v2592_v2  ;;  %v2598_v6 = vld [vmem:[#allocation3 + $0xc0] ss:$16 sps:$4 sm:$0xff]   ;;  %v2689_v52 = vld [vmem:[%s3218_s4 + $0xc] ss:$16 sps:$4 sm:$0xff]  }
  0x2b   :  { %968 = vmatpush1.bf16.msra.mxu1 %v2593_v3  ;;  %v2596_v5 = vld [vmem:[#allocation3 + $0x2c4] ss:$16 sps:$4 sm:$0xff]   ;;  %926 = vmatprep.subr.bf16.mxu0 %v2594_v4  ;;  %v2599_v7 = vld [vmem:[#allocation3 + $0x2c0] ss:$16 sps:$4 sm:$0xff]   ;;  %v2692_v3 = vld [vmem:[#allocation3 + $0xec] ss:$16 sps:$4 sm:$0xff]  }
  0x2c   :  { %2582 = vset.pattern.permute.xlu1 %v2951_v8  ;;  %969 = vmatprep.subr.bf16.mxu1 %v2596_v5  ;;  %v2600_v9 = vld [vmem:[#allocation3 + $0xa4] ss:$16 sps:$4 sm:$0xff]   ;;  %v2604_v11 = vld [vmem:[#allocation3 + $0xa0] ss:$16 sps:$4 sm:$0xff]   ;;  %v2695_v4 = vld [vmem:[#allocation3 + $0x2ec] ss:$16 sps:$4 sm:$0xff]  }
  0x2d   :  { %2583 = vset.pattern.permute.xlu0 %v2951_v8  ;;  %v2602_v10 = vld [vmem:[#allocation3 + $0x2a4] ss:$16 sps:$4 sm:$0xff]   ;;  %v2605_v12 = vld [vmem:[#allocation3 + $0x2a0] ss:$16 sps:$4 sm:$0xff]   ;;  %999 = vmatprep.mubr.bf16.mxu1 %v2689_v52  ;;  %vm1127_vm5 = vcmask 130048   ;;  %vm2954_vm10 = vmmov 0  }
  0x2e   :  { %927 = vmatpush1.bf16.msra.mxu0 %v2598_v6  ;;  %v2606_v13 = vld [vmem:[#allocation3 + $0x84] ss:$16 sps:$4 sm:$0xff]   ;;  %v2610_v15 = vld [vmem:[#allocation3 + $0x80] ss:$16 sps:$4 sm:$0xff]   ;;  %v3043_v6 = vld [vmem:[%s3218_s4 + $0x8] ss:$16 sps:$4 sm:$0xff]  }
  0x2f   :  { %970 = vmatpush1.bf16.msra.mxu1 %v2599_v7  ;;  %928 = vmatprep.subr.bf16.mxu0 %v2600_v9  ;;  %v2608_v14 = vld [vmem:[#allocation3 + $0x284] ss:$16 sps:$4 sm:$0xff]   ;;  %v2611_v16 = vld [vmem:[#allocation3 + $0x280] ss:$16 sps:$4 sm:$0xff]   ;;  %v2690_v7 = vld [vmem:[#allocation3 + $0xe8] ss:$16 sps:$4 sm:$0xff]  }
  0x30   :  { %971 = vmatprep.subr.bf16.mxu1 %v2602_v10  ;;  %v2612_v17 = vld [vmem:[#allocation3 + $0x64] ss:$16 sps:$4 sm:$0xff]   ;;  %v2616_v19 = vld [vmem:[#allocation3 + $0x60] ss:$16 sps:$4 sm:$0xff]   ;;  %v2693_v9 = vld [vmem:[#allocation3 + $0x2e8] ss:$16 sps:$4 sm:$0xff]  }
  0x31   :  { %v2614_v18 = vld [vmem:[#allocation3 + $0x264] ss:$16 sps:$4 sm:$0xff]   ;;  %v2617_v20 = vld [vmem:[#allocation3 + $0x260] ss:$16 sps:$4 sm:$0xff]   ;;  %v2698_v10 = vld [vmem:[#allocation3 + $0xcc] ss:$16 sps:$4 sm:$0xff]  }
  0x32   :  { %929 = vmatpush1.bf16.msra.mxu0 %v2604_v11  ;;  %v2618_v21 = vld [vmem:[#allocation3 + $0x44] ss:$16 sps:$4 sm:$0xff]   ;;  %v2622_v23 = vld [vmem:[#allocation3 + $0x40] ss:$16 sps:$4 sm:$0xff]   ;;  %v2701_v11 = vld [vmem:[#allocation3 + $0x2cc] ss:$16 sps:$4 sm:$0xff]  }
  0x33   :  { %972 = vmatpush1.bf16.msra.mxu1 %v2605_v12  ;;  %930 = vmatprep.subr.bf16.mxu0 %v2606_v13  ;;  %v2620_v22 = vld [vmem:[#allocation3 + $0x244] ss:$16 sps:$4 sm:$0xff]   ;;  %v2623_v24 = vld [vmem:[#allocation3 + $0x240] ss:$16 sps:$4 sm:$0xff]   ;;  %v89_v12 = vlaneseq  ;;  %v2696_v13 = vld [vmem:[#allocation3 + $0xc8] ss:$16 sps:$4 sm:$0xff]  }
  0x34   :  { %973 = vmatprep.subr.bf16.mxu1 %v2608_v14  ;;  %v2624_v25 = vld [vmem:[#allocation3 + $0x24] ss:$16 sps:$4 sm:$0xff]   ;;  %v2628_v27 = vld [vmem:[#allocation3 + $0x20] ss:$16 sps:$4 sm:$0xff]   ;;  %v2699_v14 = vld [vmem:[#allocation3 + $0x2c8] ss:$16 sps:$4 sm:$0xff]  }
  0x35   :  { %v2626_v26 = vld [vmem:[#allocation3 + $0x224] ss:$16 sps:$4 sm:$0xff]   ;;  %v2629_v28 = vld [vmem:[#allocation3 + $0x220] ss:$16 sps:$4 sm:$0xff]   ;;  %s2955_s15 = smov [#allocation9]  }
  0x36   :  { %931 = vmatpush1.bf16.msra.mxu0 %v2610_v15  ;;  %v2630_v29 = vld [vmem:[#allocation3 + $0x4] ss:$16 sps:$4 sm:$0xff]   ;;  %v2634_v31 = vld [vmem:[#allocation3] ss:$16 sps:$4 sm:$0xff]   ;;  %v2704_v15 = vld [vmem:[#allocation3 + $0xac] ss:$16 sps:$4 sm:$0xff]  }
  0x37   :  { %974 = vmatpush1.bf16.msra.mxu1 %v2611_v16  ;;  %932 = vmatprep.subr.bf16.mxu0 %v2612_v17  ;;  %v2632_v30 = vld [vmem:[#allocation3 + $0x204] ss:$16 sps:$4 sm:$0xff]   ;;  %v2635_v32 = vld [vmem:[#allocation3 + $0x200] ss:$16 sps:$4 sm:$0xff]   ;;  %v2707_v16 = vld [vmem:[#allocation3 + $0x2ac] ss:$16 sps:$4 sm:$0xff]  }
  0x38   :  { %975 = vmatprep.subr.bf16.mxu1 %v2614_v18  ;;  %v2636_v33 = vld [vmem:[#allocation3 + $0x1e4] ss:$16 sps:$4 sm:$0xff]   ;;  %v2640_v35 = vld [vmem:[#allocation3 + $0x1e0] ss:$16 sps:$4 sm:$0xff]   ;;  %v3048_v17 = vshrl.u32 %v89_v12, 7  ;;  %s2238_s5 = sshll.u32 %s2955_s15, 4  ;;  %s2239_s5 = int_to_ptr.vmem [resolvable:$true] %s2238_s5 }
  0x39   :  { %v2638_v34 = vld [vmem:[#allocation3 + $0x3e4] ss:$16 sps:$4 sm:$0xff]   ;;  %v2641_v36 = vld [vmem:[#allocation3 + $0x3e0] ss:$16 sps:$4 sm:$0xff]   ;;  %v2702_v18 = vld [vmem:[#allocation3 + $0xa8] ss:$16 sps:$4 sm:$0xff]   ;;  %p2923_p2 = scmp.lt.s32.totalorder %s2239_s5, %s2239_s5 }
  0x3a   :  { %933 = vmatpush1.bf16.msra.mxu0 %v2616_v19  ;;  %v2642_v37 = vld [vmem:[#allocation3 + $0x1c4] ss:$16 sps:$4 sm:$0xff]   ;;  %v2646_v39 = vld [vmem:[#allocation3 + $0x1c0] ss:$16 sps:$4 sm:$0xff]   ;;  %v2705_v19 = vld [vmem:[#allocation3 + $0x2a8] ss:$16 sps:$4 sm:$0xff]  }
  0x3b   :  { %976 = vmatpush1.bf16.msra.mxu1 %v2617_v20  ;;  %934 = vmatprep.subr.bf16.mxu0 %v2618_v21  ;;  %v2644_v38 = vld [vmem:[#allocation3 + $0x3c4] ss:$16 sps:$4 sm:$0xff]   ;;  %v2647_v40 = vld [vmem:[#allocation3 + $0x3c0] ss:$16 sps:$4 sm:$0xff]   ;;  %v3051_v20 = vadd.s32 8, %v3048_v17  ;;  %s2918_s8 = scalar_lea.vmem %s2239_s5, 256 }
  0x3c   :  { %977 = vmatprep.subr.bf16.mxu1 %v2620_v22  ;;  %v2648_v41 = vld [vmem:[#allocation3 + $0x1a4] ss:$16 sps:$4 sm:$0xff]   ;;  %v2652_v43 = vld [vmem:[#allocation3 + $0x1a0] ss:$16 sps:$4 sm:$0xff]   ;;  %v2710_v21 = vld [vmem:[#allocation3 + $0x8c] ss:$16 sps:$4 sm:$0xff]   ;;  %p2919_p1 = scmp.ne.s32.totalorder %s2239_s5, %s2918_s8  ;;  %p2924_p3 = scmp.lt.s32.totalorder %s2918_s8, %s2918_s8 }
  0x3d   :  { %v2650_v42 = vld [vmem:[#allocation3 + $0x3a4] ss:$16 sps:$4 sm:$0xff]   ;;  %v2653_v44 = vld [vmem:[#allocation3 + $0x3a0] ss:$16 sps:$4 sm:$0xff]   ;;  %v2713_v22 = vld [vmem:[#allocation3 + $0x28c] ss:$16 sps:$4 sm:$0xff]  }
  0x3e   :  { %935 = vmatpush1.bf16.msra.mxu0 %v2622_v23  ;;  %v2654_v45 = vld [vmem:[#allocation3 + $0x184] ss:$16 sps:$4 sm:$0xff]   ;;  %v2658_v47 = vld [vmem:[#allocation3 + $0x180] ss:$16 sps:$4 sm:$0xff]   ;;  %p2925_p4 = por %p2924_p3, %p2923_p2 }
  0x3f   :  { %978 = vmatpush1.bf16.msra.mxu1 %v2623_v24  ;;  %936 = vmatprep.subr.bf16.mxu0 %v2624_v25  ;;  %v2656_v46 = vld [vmem:[#allocation3 + $0x384] ss:$16 sps:$4 sm:$0xff]   ;;  %v2659_v48 = vld [vmem:[#allocation3 + $0x380] ss:$16 sps:$4 sm:$0xff]   ;;  %v2708_v25 = vld [vmem:[#allocation3 + $0x88] ss:$16 sps:$4 sm:$0xff]  }
  0x40   :  { %979 = vmatprep.subr.bf16.mxu1 %v2626_v26  ;;  %v2660_v49 = vld [vmem:[#allocation3 + $0x164] ss:$16 sps:$4 sm:$0xff]   ;;  %v2664_v53 = vld [vmem:[#allocation3 + $0x160] ss:$16 sps:$4 sm:$0xff]   ;;  %v2711_v26 = vld [vmem:[#allocation3 + $0x288] ss:$16 sps:$4 sm:$0xff]   ;;  %p2926_p5 = pnand %p2925_p4, %p2919_p1 }
  0x41   :  { %v2686_v50 = vld [vmem:[%s3218_s4 + $0x4] ss:$16 sps:$4 sm:$0xff]   ;;  %v2665_v54 = vld [vmem:[#allocation3 + $0x360] ss:$16 sps:$4 sm:$0xff]  }
  0x42   :  { %937 = vmatpush1.bf16.msra.mxu0 %v2628_v27  ;;  %v2662_v51 = vld [vmem:[#allocation3 + $0x364] ss:$16 sps:$4 sm:$0xff]   ;;  %956 = vmatprep.mubr.bf16.mxu0 %v2686_v50  ;;  %v2670_v57 = vld [vmem:[#allocation3 + $0x140] ss:$16 sps:$4 sm:$0xff]   ;;  %v2952_v27 = vmov 0.0  }
  0x43   :  { %980 = vmatpush1.bf16.msra.mxu1 %v2629_v28  ;;  %938 = vmatprep.subr.bf16.mxu0 %v2630_v29  ;;  %v2666_v55 = vld [vmem:[#allocation3 + $0x144] ss:$16 sps:$4 sm:$0xff]   ;;  %v2671_v58 = vld [vmem:[#allocation3 + $0x340] ss:$16 sps:$4 sm:$0xff]   ;;  %v2716_v29 = vld [vmem:[#allocation3 + $0x6c] ss:$16 sps:$4 sm:$0xff]  }
  0x44   :  { %981 = vmatprep.subr.bf16.mxu1 %v2632_v30  ;;  %v2668_v56 = vld [vmem:[#allocation3 + $0x344] ss:$16 sps:$4 sm:$0xff]   ;;  %v2676_v61 = vld [vmem:[#allocation3 + $0x120] ss:$16 sps:$4 sm:$0xff]   ;;  %v2719_v30 = vld [vmem:[#allocation3 + $0x26c] ss:$16 sps:$4 sm:$0xff]  }
  0x45   :  { %v2672_v59 = vld [vmem:[#allocation3 + $0x124] ss:$16 sps:$4 sm:$0xff]   ;;  %v2677_v62 = vld [vmem:[#allocation3 + $0x320] ss:$16 sps:$4 sm:$0xff]  }
  0x46   :  { %939 = vmatpush1.bf16.msra.mxu0 %v2634_v31  ;;  %v2674_v60 = vld [vmem:[#allocation3 + $0x324] ss:$16 sps:$4 sm:$0xff]   ;;  %v2682_v1 = vld [vmem:[#allocation3 + $0x100] ss:$16 sps:$4 sm:$0xff]  }
  0x47   :  { %982 = vmatpush1.bf16.msra.mxu1 %v2635_v32  ;;  %940 = vmatprep.subr.bf16.mxu0 %v2636_v33  ;;  %v2678_v63 = vld [vmem:[#allocation3 + $0x104] ss:$16 sps:$4 sm:$0xff]   ;;  %v2683_v2 = vld [vmem:[#allocation3 + $0x300] ss:$16 sps:$4 sm:$0xff]  }
  0x48   :  { %983 = vmatprep.subr.bf16.mxu1 %v2638_v34  ;;  %v2680_v0 = vld [vmem:[#allocation3 + $0x304] ss:$16 sps:$4 sm:$0xff]   ;;  %v3038_v5 = vld [vmem:[%s3218_s4] ss:$16 sps:$4 sm:$0xff]  }
  0x49   :  { %v2251_v23 = vld [vmem:[%s3215_s1] ss:$0 sm:$0xff] }
  0x4a   :  { %941 = vmatpush2.bf16.msra.mxu0 %v2640_v35  ;;  %v2385_v24 = vld [vmem:[%s3217_s3] ss:$0 sm:$0xff]  ;;  %vm98_vm0 = vcmp.eq.s32.totalorder %v3048_v17, %v2251_v23  ;;  %vm99_vm2 = vcmp.eq.s32.totalorder %v3051_v20, %v2251_v23  ;;  %v2714_v35 = vld [vmem:[#allocation3 + $0x68] ss:$16 sps:$4 sm:$0xff]  }
  0x4b   :  { %984 = vmatpush2.bf16.msra.mxu1 %v2641_v36  ;;  %942 = vmatprep.subr.bf16.mxu0 %v2642_v37  ;;  %v3062_v28 = vsel %vm98_vm0, 1.0, %v2952_v27  ;;  %v3066_v32 = vsel %vm99_vm2, 1.0, %v2952_v27  ;;  %v2717_v36 = vld [vmem:[#allocation3 + $0x268] ss:$16 sps:$4 sm:$0xff]  }
  0x4c   :  { %985 = vmatprep.subr.bf16.mxu1 %v2644_v38  ;;  %v1102_v31 = vmul.f32 %v2385_v24, %v3062_v28  ;;  %v1103_v33 = vmul.f32 %v2385_v24, %v3066_v32  ;;  %v2722_v38 = vld [vmem:[#allocation3 + $0x4c] ss:$16 sps:$4 sm:$0xff]   ;;  %v2774_v23 = vld [vmem:[#allocation3 + $0x128] ss:$16 sps:$4 sm:$0xff]  }
  0x4d   :  { %v2777_v24 = vld [vmem:[#allocation3 + $0x328] ss:$16 sps:$4 sm:$0xff]  }
  0x4e   :  { %943 = vmatpush2.bf16.msra.mxu0 %v2646_v39  ;;  %v1105_v34 = vsel %vm1104_vm1, %v1102_v31, 0.0  ;;  %v3070_v37 = vpack.c.bf16 %v1103_v33, %v1102_v31  ;;  %v2725_v39 = vld [vmem:[#allocation3 + $0x24c] ss:$16 sps:$4 sm:$0xff]  }
  0x4f   :  { %986 = vmatpush2.bf16.msra.mxu1 %v2647_v40  ;;  %944 = vmatprep.subr.bf16.mxu0 %v2648_v41  ;;  %v1108_v40 = vsel %vm1104_vm1, %v1103_v33, 0.0  ;;  %v2720_v41 = vld [vmem:[#allocation3 + $0x48] ss:$16 sps:$4 sm:$0xff]  }
  0x50   :  { %987 = vmatprep.subr.bf16.mxu1 %v2650_v42  ;;  %1106 = vadd.xlane.f32.xlu0 %v1105_v34  ;;  %v2723_v42 = vld [vmem:[#allocation3 + $0x248] ss:$16 sps:$4 sm:$0xff]  }
  0x52   :  { %945 = vmatpush2.bf16.msra.mxu0 %v2652_v43  ;;  %v2728_v43 = vld [vmem:[#allocation3 + $0x2c] ss:$16 sps:$4 sm:$0xff]  }
  0x53   :  { %988 = vmatpush2.bf16.msra.mxu1 %v2653_v44  ;;  %946 = vmatprep.subr.bf16.mxu0 %v2654_v45  ;;  %v2731_v44 = vld [vmem:[#allocation3 + $0x22c] ss:$16 sps:$4 sm:$0xff]   ;;  %v2726_v45 = vld [vmem:[#allocation3 + $0x28] ss:$16 sps:$4 sm:$0xff]  }
  0x54   :  { %989 = vmatprep.subr.bf16.mxu1 %v2656_v46  ;;  %1109 = vadd.xlane.f32.xlu0 %v1108_v40  ;;  %v2729_v46 = vld [vmem:[#allocation3 + $0x228] ss:$16 sps:$4 sm:$0xff]  }
  0x56   :  { %947 = vmatpush2.bf16.msra.mxu0 %v2658_v47  ;;  %v84_v47 = vld [vmem:[%s3216_s2] sm:$0xff] }
  0x57   :  { %990 = vmatpush2.bf16.msra.mxu1 %v2659_v48  ;;  %948 = vmatprep.subr.bf16.mxu0 %v2660_v49  ;;  %v2734_v48 = vld [vmem:[#allocation3 + $0xc] ss:$16 sps:$4 sm:$0xff]  }
  0x58   :  { %991 = vmatprep.subr.bf16.mxu1 %v2662_v51  ;;  %v2737_v49 = vld [vmem:[#allocation3 + $0x20c] ss:$16 sps:$4 sm:$0xff]   ;;  %v2732_v51 = vld [vmem:[#allocation3 + $0x8] ss:$16 sps:$4 sm:$0xff]   ;;  %111 = vperm.xlu1 %2582, %v84_v47  }
  0x5a   :  { %949 = vmatpush2.bf16.msra.mxu0 %v2664_v53  ;;  %v2740_v53 = vld [vmem:[#allocation3 + $0x1ec] ss:$16 sps:$4 sm:$0xff]  }
  0x5b   :  { %992 = vmatpush2.bf16.msra.mxu1 %v2665_v54  ;;  %950 = vmatprep.subr.bf16.mxu0 %v2666_v55  ;;  %v2743_v54 = vld [vmem:[#allocation3 + $0x3ec] ss:$16 sps:$4 sm:$0xff]  }
  0x5c   :  { %993 = vmatprep.subr.bf16.mxu1 %v2668_v56  ;;  %v87_v55 = vld [vmem:[%s3216_s2 + $0x18] sm:$0xff] }
  0x5d   :  { %v2738_v56 = vld [vmem:[#allocation3 + $0x1e8] ss:$16 sps:$4 sm:$0xff]  }
  0x5e   :  { %951 = vmatpush2.bf16.msra.mxu0 %v2670_v57  ;;  %v2741_v57 = vld [vmem:[#allocation3 + $0x3e8] ss:$16 sps:$4 sm:$0xff]  }
  0x5f   :  { %994 = vmatpush2.bf16.msra.mxu1 %v2671_v58  ;;  %952 = vmatprep.subr.bf16.mxu0 %v2672_v59  ;;  %v2746_v58 = vld [vmem:[#allocation3 + $0x1cc] ss:$16 sps:$4 sm:$0xff]  }
  0x60   :  { %995 = vmatprep.subr.bf16.mxu1 %v2674_v60  ;;  %v2749_v59 = vld [vmem:[#allocation3 + $0x3cc] ss:$16 sps:$4 sm:$0xff]   ;;  %v2744_v60 = vld [vmem:[#allocation3 + $0x1c8] ss:$16 sps:$4 sm:$0xff]  }
  0x62   :  { %953 = vmatpush2.bf16.msra.mxu0 %v2676_v61  ;;  %v2747_v61 = vld [vmem:[#allocation3 + $0x3c8] ss:$16 sps:$4 sm:$0xff]  }
  0x63   :  { %996 = vmatpush2.bf16.msra.mxu1 %v2677_v62  ;;  %954 = vmatprep.subr.bf16.mxu0 %v2678_v63  ;;  %v2752_v62 = vld [vmem:[#allocation3 + $0x1ac] ss:$16 sps:$4 sm:$0xff]  }
  0x64   :  { %997 = vmatprep.subr.bf16.mxu1 %v2680_v0  ;;  %v2755_v63 = vld [vmem:[#allocation3 + $0x3ac] ss:$16 sps:$4 sm:$0xff]   ;;  %v2750_v0 = vld [vmem:[#allocation3 + $0x1a8] ss:$16 sps:$4 sm:$0xff]  }
  0x66   :  { %955 = vmatpush2.bf16.msra.mxu0 %v2682_v1  ;;  %v2753_v1 = vld [vmem:[#allocation3 + $0x3a8] ss:$16 sps:$4 sm:$0xff]  }
  0x67   :  { %998 = vmatpush2.bf16.msra.mxu1 %v2683_v2  ;;  %1010 = vmatprep.subr.bf16.mxu0 %v2692_v3  ;;  %v2758_v2 = vld [vmem:[#allocation3 + $0x18c] ss:$16 sps:$4 sm:$0xff]  }
  0x68   :  { %1053 = vmatprep.subr.bf16.mxu1 %v2695_v4  ;;  %v2761_v3 = vld [vmem:[#allocation3 + $0x38c] ss:$16 sps:$4 sm:$0xff]   ;;  %v86_v4 = vld [vmem:[%s3216_s2 + $0x10] sm:$0xff] }
  0x69   :  { %957 = vmatmul.mubr.bf16.vlgmr.msra.gmra.mxu0 %v3038_v5 }
  0x6a   :  { %1000 = vmatmul.mubr.bf16.vlgmr.msra.gmra.mxu1 %v3043_v6  ;;  %1011 = vmatpush1.bf16.msra.mxu0 %v2690_v7  ;;  %v2756_v7 = vld [vmem:[#allocation3 + $0x188] ss:$16 sps:$4 sm:$0xff]  }
  0x6b   :  { %1054 = vmatpush1.bf16.msra.mxu1 %v2693_v9  ;;  %1012 = vmatprep.subr.bf16.mxu0 %v2698_v10  ;;  %v2759_v9 = vld [vmem:[#allocation3 + $0x388] ss:$16 sps:$4 sm:$0xff]   ;;  %v2764_v10 = vld [vmem:[#allocation3 + $0x16c] ss:$16 sps:$4 sm:$0xff]  }
  0x6c   :  { %1055 = vmatprep.subr.bf16.mxu1 %v2701_v11  ;;  %1042 = vmatprep.mubr.bf16.mxu0 %v2686_v50  ;;  %v85_v50 = vld [vmem:[%s3216_s2 + $0x8] sm:$0xff] }
  0x6d   :  { %1085 = vmatprep.mubr.bf16.mxu1 %v2689_v52  ;;  %v2735_v52 = vld [vmem:[#allocation3 + $0x208] ss:$16 sps:$4 sm:$0xff]   ;;  %114 = vperm.xlu1 %2582, %v85_v50   ;;  %v2767_v11 = vld [vmem:[#allocation3 + $0x36c] ss:$16 sps:$4 sm:$0xff]  }
  0x6e   :  { %1013 = vmatpush1.bf16.msra.mxu0 %v2696_v13  ;;  %v2762_v13 = vld [vmem:[#allocation3 + $0x168] ss:$16 sps:$4 sm:$0xff]   ;;  %117 = vperm.xlu0 %2583, %v86_v4  }
  0x6f   :  { %1056 = vmatpush1.bf16.msra.mxu1 %v2699_v14  ;;  %1014 = vmatprep.subr.bf16.mxu0 %v2704_v15  ;;  %v2765_v14 = vld [vmem:[#allocation3 + $0x368] ss:$16 sps:$4 sm:$0xff]   ;;  %v2770_v15 = vld [vmem:[#allocation3 + $0x14c] ss:$16 sps:$4 sm:$0xff]  }
  0x70   :  { %1057 = vmatprep.subr.bf16.mxu1 %v2707_v16  ;;  %v2773_v16 = vld [vmem:[#allocation3 + $0x34c] ss:$16 sps:$4 sm:$0xff]  }
  0x71   :  { %120 = vperm.xlu1 %2582, %v87_v55  }
  0x72   :  { %1015 = vmatpush1.bf16.msra.mxu0 %v2702_v18  ;;  %v2768_v18 = vld [vmem:[#allocation3 + $0x148] ss:$16 sps:$4 sm:$0xff]  }
  0x73   :  { %1058 = vmatpush1.bf16.msra.mxu1 %v2705_v19  ;;  %1016 = vmatprep.subr.bf16.mxu0 %v2710_v21  ;;  %v2771_v19 = vld [vmem:[#allocation3 + $0x348] ss:$16 sps:$4 sm:$0xff]   ;;  %v2776_v21 = vld [vmem:[#allocation3 + $0x12c] ss:$16 sps:$4 sm:$0xff]  }
  0x74   :  { %1059 = vmatprep.subr.bf16.mxu1 %v2713_v22  ;;  %v2779_v22 = vld [vmem:[#allocation3 + $0x32c] ss:$16 sps:$4 sm:$0xff]  }
  0x76   :  { %1017 = vmatpush1.bf16.msra.mxu0 %v2708_v25  ;;  %v2782_v25 = vld [vmem:[#allocation3 + $0x10c] ss:$16 sps:$4 sm:$0xff]  }
  0x77   :  { %1060 = vmatpush1.bf16.msra.mxu1 %v2711_v26  ;;  %1018 = vmatprep.subr.bf16.mxu0 %v2716_v29  ;;  %v2785_v26 = vld [vmem:[#allocation3 + $0x30c] ss:$16 sps:$4 sm:$0xff]   ;;  %v2780_v29 = vld [vmem:[#allocation3 + $0x108] ss:$16 sps:$4 sm:$0xff]  }
  0x78   :  { %1061 = vmatprep.subr.bf16.mxu1 %v2719_v30  ;;  %v2783_v30 = vld [vmem:[#allocation3 + $0x308] ss:$16 sps:$4 sm:$0xff]  }
  0x7a   :  { %1019 = vmatpush1.bf16.msra.mxu0 %v2714_v35 }
  0x7b   :  { %1062 = vmatpush1.bf16.msra.mxu1 %v2717_v36  ;;  %1020 = vmatprep.subr.bf16.mxu0 %v2722_v38 }
  0x7c   :  { %1063 = vmatprep.subr.bf16.mxu1 %v2725_v39 }
  0x7e   :  { %1021 = vmatpush1.bf16.msra.mxu0 %v2720_v41 }
  0x7f   :  { %1064 = vmatpush1.bf16.msra.mxu1 %v2723_v42  ;;  %1022 = vmatprep.subr.bf16.mxu0 %v2728_v43  ;;  %v93_v42 = vand.u32 127, %v89_v12 }
  0x80   :  { %1065 = vmatprep.subr.bf16.mxu1 %v2731_v44 }
  0x82   :  { %1023 = vmatpush1.bf16.msra.mxu0 %v2726_v45 }
  0x83   :  { %1066 = vmatpush1.bf16.msra.mxu1 %v2729_v46  ;;  %1024 = vmatprep.subr.bf16.mxu0 %v2734_v48 }
  0x84   :  { %1067 = vmatprep.subr.bf16.mxu1 %v2737_v49 }
  0x86   :  { %1025 = vmatpush1.bf16.msra.mxu0 %v2732_v51 }
  0x87   :  { %1068 = vmatpush1.bf16.msra.mxu1 %v2735_v52  ;;  %1026 = vmatprep.subr.bf16.mxu0 %v2740_v53 }
  0x88   :  { %1069 = vmatprep.subr.bf16.mxu1 %v2743_v54 }
  0x8a   :  { %1027 = vmatpush2.bf16.msra.mxu0 %v2738_v56 }
  0x8b   :  { %1070 = vmatpush2.bf16.msra.mxu1 %v2741_v57  ;;  %1028 = vmatprep.subr.bf16.mxu0 %v2746_v58 }
  0x8c   :  { %1071 = vmatprep.subr.bf16.mxu1 %v2749_v59 }
  0x8e   :  { %1029 = vmatpush2.bf16.msra.mxu0 %v2744_v60 }
  0x8f   :  { %1072 = vmatpush2.bf16.msra.mxu1 %v2747_v61  ;;  %1030 = vmatprep.subr.bf16.mxu0 %v2752_v62 }
  0x90   :  { %1073 = vmatprep.subr.bf16.mxu1 %v2755_v63 }
  0x92   :  { %1031 = vmatpush2.bf16.msra.mxu0 %v2750_v0 }
  0x93   :  { %1074 = vmatpush2.bf16.msra.mxu1 %v2753_v1  ;;  %1032 = vmatprep.subr.bf16.mxu0 %v2758_v2 }
  0x94   :  { %1075 = vmatprep.subr.bf16.mxu1 %v2761_v3 }
  0x96   :  { %1033 = vmatpush2.bf16.msra.mxu0 %v2756_v7 }
  0x97   :  { %1076 = vmatpush2.bf16.msra.mxu1 %v2759_v9  ;;  %1034 = vmatprep.subr.bf16.mxu0 %v2764_v10 }
  0x98   :  { %1077 = vmatprep.subr.bf16.mxu1 %v2767_v11 }
  0x9a   :  { %1035 = vmatpush2.bf16.msra.mxu0 %v2762_v13 }
  0x9b   :  { %1078 = vmatpush2.bf16.msra.mxu1 %v2765_v14  ;;  %1036 = vmatprep.subr.bf16.mxu0 %v2770_v15 }
  0x9c   :  { %1079 = vmatprep.subr.bf16.mxu1 %v2773_v16 }
  0x9e   :  { %1037 = vmatpush2.bf16.msra.mxu0 %v2768_v18 }
  0x9f   :  { %1080 = vmatpush2.bf16.msra.mxu1 %v2771_v19  ;;  %1038 = vmatprep.subr.bf16.mxu0 %v2776_v21 }
  0xa0   :  { %1081 = vmatprep.subr.bf16.mxu1 %v2779_v22 }
  0xa2   :  { %1039 = vmatpush2.bf16.msra.mxu0 %v2774_v23 }
  0xa3   :  { %1082 = vmatpush2.bf16.msra.mxu1 %v2777_v24  ;;  %1040 = vmatprep.subr.bf16.mxu0 %v2782_v25 }
  0xa4   :  { %1083 = vmatprep.subr.bf16.mxu1 %v2785_v26 }
  0xa6   :  { %1041 = vmatpush2.bf16.msra.mxu0 %v2780_v29 }
  0xa7   :  { %1084 = vmatpush2.bf16.msra.mxu1 %v2783_v30 }
  0xa9   :  { %1043 = vmatmul.mubr.bf16.vlgmr.msra.gmra.mxu0 %v3038_v5 }
  0xaa   :  { %1086 = vmatmul.mubr.bf16.vlgmr.msra.gmra.mxu1 %v3043_v6  ;;  %1166 = vmatprep.mubr.bf16.mxu0 %v2951_v8 }
  0xab   :  { %1219 = vmatprep.mubr.bf16.mxu1 %v2951_v8 }
  0xd3   :  { %v112_v36 = vpop.permute.xlu1 %111 }
  0xd4   :  { %vm122_vm3 = vcmp.eq.s32.totalorder %v93_v42, %v112_v36 }
  0xd5   :  { %v126_v55 = vsel %vm122_vm3, 1.0, %v2952_v27 }
  0xd9   :  { %v1107_v31 = vpop.xlane.xlu0 %1106 }
  0xda   :  { %v1111_v35 = vadd.f32 1.0, %v1107_v31 }
  0xdd   :  { %v1110_v33 = vpop.xlane.xlu0 %1109 }
  0xde   :  { %v1112_v34 = vadd.f32 1.0, %v1110_v33 }
  0xe0   :  { %2850 = vrsqrt.f32 %v1112_v34 }
  0xe1   :  { %2852 = vrsqrt.f32 %v1111_v35 }
  0xe8   :  { %v115_v5 = vpop.permute.xlu1 %114 }
  0xe9   :  { %vm123_vm4 = vcmp.eq.s32.totalorder %v93_v42, %v115_v5  ;;  %v118_v60 = vpop.permute.xlu0 %117  ;;  %v2788_v5 = vld [vmem:[#allocation6 + $0x70] sm:$0xff]  }
  0xea   :  { %v127_v56 = vsel %vm123_vm4, 1.0, %v2952_v27  ;;  %vm124_vm7 = vcmp.eq.s32.totalorder %v93_v42, %v118_v60 }
  0xeb   :  { %v3112_v61 = vpack.c.bf16 %v127_v56, %v126_v55  ;;  %v128_v63 = vsel %vm124_vm7, 1.0, %v2952_v27 }
  0xec   :  { %v121_v59 = vpop.permute.xlu1 %120 }
  0xed   :  { %v3090_v44 = vpop.eup %2850  ;;  %vm125_vm6 = vcmp.eq.s32.totalorder %v93_v42, %v121_v59  ;;  %v2787_v42 = vld [vmem:[#allocation6 + $0x38] sm:$0xff]  }
  0xee   :  { %v3092_v47 = vpop.eup %2852  ;;  %v129_v62 = vsel %vm125_vm6, 1.0, %v2952_v27 }
  0xef   :  { %v3119_v0 = vpack.c.bf16 %v129_v62, %v128_v63 }
 0x129   :  { %v958_v38 = vpop.f32.mrf.mxu0 }
 0x12a   :  { %v1001_v39 = vpop.f32.mrf.mxu1 }
 0x12b   :  { %v960_v40 = vpop.f32.mrf.mxu0  ;;  %v1002_v48 = vadd.f32 %v1001_v39, %v958_v38 }
 0x12c   :  { %v1003_v41 = vpop.f32.mrf.mxu1 }
 0x12d   :  { %v962_v43 = vpop.f32.mrf.mxu0  ;;  %v1004_v45 = vadd.f32 %v1003_v41, %v960_v40  ;;  %v3104_v54 = vmul.f32 %v3092_v47, %v1002_v48  ;;  %v2786_v41 = vld [vmem:[#allocation6 + $0x78] sm:$0xff]   ;;  %v2793_v48 = vld [vmem:[#allocation6 + $0x20] sm:$0xff]  }
 0x12e   :  { %v1005_v6 = vpop.f32.mrf.mxu1 }
 0x12f   :  { %v1006_v46 = vadd.f32 %v1005_v6, %v962_v43  ;;  %v964_v49 = vpop.f32.mrf.mxu0  ;;  %v3098_v12 = vmul.f32 %v3092_v47, %v1004_v45  ;;  %v2789_v43 = vld [vmem:[#allocation6 + $0x30] sm:$0xff]   ;;  %v2790_v6 = vld [vmem:[#allocation6 + $0x68] sm:$0xff]  }
 0x130   :  { %v1007_v50 = vpop.f32.mrf.mxu1  ;;  %v2791_v45 = vld [vmem:[#allocation6 + $0x28] sm:$0xff]  }
 0x131   :  { %v1008_v51 = vadd.f32 %v1007_v50, %v964_v49  ;;  %v3095_v52 = vmul.f32 %v3090_v44, %v1006_v46  ;;  %v2792_v46 = vld [vmem:[#allocation6 + $0x60] sm:$0xff]  }
 0x133   :  { %v3101_v53 = vmul.f32 %v3090_v44, %v1008_v51  ;;  %v1123_v58 = vpack.c.bf16 %v3095_v52, %v3104_v54 }
 0x135   :  { %v1124_v57 = vpack.c.bf16 %v3101_v53, %v3098_v12 }
 0x137   :  { %1148 = vmatprep.subr.bf16.mxu0 %v1124_v57 }
 0x138   :  { %1149 = vmatpush1.bf16.msra.mxu0 %v1123_v58 }
 0x13b   :  { %2386 = vmatmul.mubr.msk.bf16.vlgmr.msra.gmra.mxu0 %vm1127_vm5, %v3112_v61 }
 0x13c   :  { %1176 = vmatprep.mubr.bf16.mxu0 %v2951_v8 }
 0x143   :  { %2387 = vmatmul.mubr.msk.bf16.gmra.mxu0 %vm1127_vm5, %v3119_v0 }
 0x144   :  { %1284 = vmatprep.mubr.bf16.mxu0 %v2951_v8 }
 0x169   :  { %v1044_v1 = vpop.f32.mrf.mxu0 }
 0x16a   :  { %v1087_v2 = vpop.f32.mrf.mxu1 }
 0x16b   :  { %v1046_v3 = vpop.f32.mrf.mxu0  ;;  %v1088_v13 = vadd.f32 %v1087_v2, %v1044_v1  ;;  %v2794_v2 = vld [vmem:[#allocation6 + $0x58] sm:$0xff]  }
 0x16c   :  { %v1089_v4 = vpop.f32.mrf.mxu1 }
 0x16d   :  { %v1048_v7 = vpop.f32.mrf.mxu0  ;;  %v1090_v10 = vadd.f32 %v1089_v4, %v1046_v3  ;;  %v3134_v22 = vmul.f32 %v3092_v47, %v1088_v13  ;;  %v2795_v3 = vld [vmem:[#allocation6 + $0x18] sm:$0xff]   ;;  %v2796_v4 = vld [vmem:[#allocation6 + $0x50] sm:$0xff]   ;;  %v2801_v13 = vld [vmem:[#allocation6] sm:$0xff]  }
 0x16e   :  { %v1091_v9 = vpop.f32.mrf.mxu1 }
 0x16f   :  { %v1092_v11 = vadd.f32 %v1091_v9, %v1048_v7  ;;  %v1050_v14 = vpop.f32.mrf.mxu0  ;;  %v3128_v19 = vmul.f32 %v3092_v47, %v1090_v10  ;;  %v2797_v7 = vld [vmem:[#allocation6 + $0x10] sm:$0xff]   ;;  %v2798_v9 = vld [vmem:[#allocation6 + $0x48] sm:$0xff]  }
 0x170   :  { %v1093_v15 = vpop.f32.mrf.mxu1  ;;  %v2799_v10 = vld [vmem:[#allocation6 + $0x8] sm:$0xff]  }
 0x171   :  { %v1094_v16 = vadd.f32 %v1093_v15, %v1050_v14  ;;  %v3125_v18 = vmul.f32 %v3090_v44, %v1092_v11  ;;  %v2800_v11 = vld [vmem:[#allocation6 + $0x40] sm:$0xff]   ;;  %v2802_v14 = vld [vmem:[#allocation8 + $0x78] sm:$0xff]  }
 0x172   :  { %v2818_v15 = vld [vmem:[#allocation6 + $0xf8] sm:$0xff]  }
 0x173   :  { %v3131_v21 = vmul.f32 %v3090_v44, %v1094_v16  ;;  %v1125_v24 = vpack.c.bf16 %v3125_v18, %v3134_v22  ;;  %v2820_v16 = vld [vmem:[#allocation6 + $0xf0] sm:$0xff]  }
 0x175   :  { %v1126_v23 = vpack.c.bf16 %v3131_v21, %v3128_v19 }
 0x177   :  { %1201 = vmatprep.subr.bf16.mxu1 %v1126_v23  ;;  %v2821_v23 = vld [vmem:[#allocation6 + $0xb0] sm:$0xff]  }
 0x178   :  { %1202 = vmatpush1.bf16.msra.mxu1 %v1125_v24  ;;  %v2822_v24 = vld [vmem:[#allocation6 + $0xe8] sm:$0xff]  }
 0x17b   :  { %2388 = vmatmul.mubr.msk.bf16.vlgmr.msra.gmra.mxu1 %vm1127_vm5, %v3112_v61 }
 0x17c   :  { %1229 = vmatprep.mubr.bf16.mxu1 %v2951_v8 }
 0x183   :  { %2389 = vmatmul.mubr.msk.bf16.gmra.mxu1 %vm1127_vm5, %v3119_v0 }
 0x184   :  { %1327 = vmatprep.mubr.bf16.mxu1 %v2951_v8 }
 0x1fb   :  { %v1168_v25 = vpop.f32.mrf.mxu0 }
 0x1fd   :  { %v1170_v26 = vpop.f32.mrf.mxu0 }
 0x1ff   :  { %v1172_v29 = vpop.f32.mrf.mxu0 }
 0x200   :  { %v1241_v40 = vpack.c.bf16 %v1172_v29, %v1168_v25  ;;  %v2823_v25 = vld [vmem:[#allocation6 + $0xa8] sm:$0xff]   ;;  %v2825_v29 = vld [vmem:[#allocation6 + $0xa0] sm:$0xff]  }
 0x201   :  { %v1174_v30 = vpop.f32.mrf.mxu0 }
 0x202   :  { %v1242_v38 = vpack.c.bf16 %v1174_v30, %v1170_v26  ;;  %v2824_v26 = vld [vmem:[#allocation6 + $0xe0] sm:$0xff]   ;;  %v2826_v30 = vld [vmem:[#allocation6 + $0xd8] sm:$0xff]  }
 0x203   :  { %v1178_v31 = vpop.f32.mrf.mxu0 }
 0x205   :  { %v1180_v33 = vpop.f32.mrf.mxu0 }
 0x207   :  { %v1182_v34 = vpop.f32.mrf.mxu0 }
 0x208   :  { %v1245_v35 = vpack.c.bf16 %v1182_v34, %v1178_v31  ;;  %v2827_v31 = vld [vmem:[#allocation6 + $0x98] sm:$0xff]   ;;  %v2829_v34 = vld [vmem:[#allocation6 + $0x90] sm:$0xff]  }
 0x209   :  { %v1184_v36 = vpop.f32.mrf.mxu0 }
 0x20a   :  { %v1246_v39 = vpack.c.bf16 %v1184_v36, %v1180_v33  ;;  %v2828_v33 = vld [vmem:[#allocation6 + $0xd0] sm:$0xff]   ;;  %v2831_v36 = vld [vmem:[#allocation6 + $0x88] sm:$0xff]  }
 0x20c   :  { %1264 = vmatprep.subr.bf16.mxu0 %v1246_v39  ;;  %v2833_v39 = vld [vmem:[#allocation6 + $0x80] sm:$0xff]  }
 0x20d   :  { %1265 = vmatpush1.bf16.msra.mxu0 %v1245_v35  ;;  %v2830_v35 = vld [vmem:[#allocation6 + $0xc8] sm:$0xff]  }
 0x20e   :  { %1266 = vmatprep.subr.bf16.mxu0 %v1242_v38  ;;  %v2832_v38 = vld [vmem:[#allocation6 + $0xc0] sm:$0xff]  }
 0x211   :  { %1267 = vmatpush1.bf16.msra.mxu0 %v1241_v40  ;;  %v2834_v40 = vld [vmem:[#allocation8 + $0xf8] sm:$0xff]  }
 0x212   :  { %2460 = vmatprep.subr.bf16.mxu0 %v2786_v41 }
 0x214   :  { %2390 = vmatmul.mubr.msk.bf16.vlgmr.msra.gmra.mxu0 %vm1104_vm1, %v3070_v37 }
 0x215   :  { %2461 = vmatpush3.bf16.msra.mxu0 %v2787_v42  ;;  %v1354_v42 = vsub.s32 1, %v3048_v17 }
 0x216   :  { %2462 = vmatprep.subr.bf16.mxu0 %v2788_v5 }
 0x219   :  { %2463 = vmatpush3.bf16.msra.mxu0 %v2789_v43  ;;  %v1350_v43 = vsub.s32 0, %v3048_v17 }
 0x21a   :  { %2464 = vmatprep.subr.bf16.mxu0 %v2790_v6 }
 0x21d   :  { %2465 = vmatpush3.bf16.msra.mxu0 %v2791_v45  ;;  %v3156_v45 = vld [vmem:[%s3220_s6] sm:$0xf] }
 0x21e   :  { %2466 = vmatprep.subr.bf16.mxu0 %v2792_v46 }
 0x221   :  { %2467 = vmatpush3.bf16.msra.mxu0 %v2793_v48 }
 0x222   :  { %2468 = vmatprep.subr.bf16.mxu0 %v2794_v2 }
 0x225   :  { %2469 = vmatpush3.bf16.msra.mxu0 %v2795_v3 }
 0x226   :  { %2470 = vmatprep.subr.bf16.mxu0 %v2796_v4 }
 0x229   :  { %2471 = vmatpush3.bf16.msra.mxu0 %v2797_v7  ;;  %v2803_v7 = vld [vmem:[#allocation8 + $0x38] sm:$0xff]  }
 0x22a   :  { %2472 = vmatprep.subr.bf16.mxu0 %v2798_v9 }
 0x22d   :  { %2473 = vmatpush3.bf16.msra.mxu0 %v2799_v10  ;;  %v2804_v10 = vld [vmem:[#allocation8 + $0x70] sm:$0xff]  }
 0x22e   :  { %2474 = vmatprep.subr.bf16.mxu0 %v2800_v11  ;;  %v2805_v11 = vld [vmem:[#allocation8 + $0x30] sm:$0xff]  }
 0x231   :  { %2475 = vmatpush3.bf16.msra.mxu0 %v2801_v13  ;;  %v2807_v13 = vld [vmem:[#allocation8 + $0x28] sm:$0xff]  }
 0x232   :  { %2504 = vmatprep.subr.bf16.mxu0 %v2802_v14  ;;  %v2808_v14 = vld [vmem:[#allocation8 + $0x60] sm:$0xff]  }
 0x23b   :  { %v1221_v49 = vpop.f32.mrf.mxu1 }
 0x23d   :  { %v1223_v50 = vpop.f32.mrf.mxu1 }
 0x23f   :  { %v1225_v51 = vpop.f32.mrf.mxu1 }
 0x240   :  { %v1243_v1 = vpack.c.bf16 %v1225_v51, %v1221_v49 }
 0x241   :  { %v1227_v55 = vpop.f32.mrf.mxu1 }
 0x242   :  { %v1244_v63 = vpack.c.bf16 %v1227_v55, %v1223_v50  ;;  %v1355_v50 = vrot.slane %v3156_v45, %v1354_v42 }
 0x243   :  { %v1231_v56 = vpop.f32.mrf.mxu1 }
 0x245   :  { %v1233_v57 = vpop.f32.mrf.mxu1 }
 0x247   :  { %v1235_v58 = vpop.f32.mrf.mxu1 }
 0x248   :  { %v1247_v62 = vpack.c.bf16 %v1235_v58, %v1231_v56 }
 0x249   :  { %v1237_v59 = vpop.f32.mrf.mxu1 }
 0x24a   :  { %v1248_v60 = vpack.c.bf16 %v1237_v59, %v1233_v57 }
 0x24c   :  { %1307 = vmatprep.subr.bf16.mxu1 %v1248_v60 }
 0x24d   :  { %1308 = vmatpush1.bf16.msra.mxu1 %v1247_v62 }
 0x24e   :  { %1309 = vmatprep.subr.bf16.mxu1 %v1244_v63 }
 0x251   :  { %1310 = vmatpush1.bf16.msra.mxu1 %v1243_v1 }
 0x252   :  { %2482 = vmatprep.subr.bf16.mxu1 %v2818_v15  ;;  %v2809_v15 = vld [vmem:[#allocation8 + $0x20] sm:$0xff]  }
 0x254   :  { %2391 = vmatmul.mubr.msk.bf16.vlgmr.msra.gmra.mxu1 %vm1104_vm1, %v3070_v37  ;;  %v2819_v37 = vld [vmem:[#allocation6 + $0xb8] sm:$0xff]  }
 0x255   :  { %2483 = vmatpush3.bf16.msra.mxu1 %v2819_v37  ;;  %v2810_v37 = vld [vmem:[#allocation8 + $0x58] sm:$0xff]  }
 0x256   :  { %2484 = vmatprep.subr.bf16.mxu1 %v2820_v16  ;;  %v2811_v16 = vld [vmem:[#allocation8 + $0x18] sm:$0xff]  }
 0x259   :  { %2485 = vmatpush3.bf16.msra.mxu1 %v2821_v23  ;;  %v2812_v23 = vld [vmem:[#allocation8 + $0x50] sm:$0xff]  }
 0x25a   :  { %2486 = vmatprep.subr.bf16.mxu1 %v2822_v24  ;;  %v2813_v24 = vld [vmem:[#allocation8 + $0x10] sm:$0xff]  }
 0x25d   :  { %2487 = vmatpush3.bf16.msra.mxu1 %v2823_v25  ;;  %v2814_v25 = vld [vmem:[#allocation8 + $0x48] sm:$0xff]  }
 0x25e   :  { %2488 = vmatprep.subr.bf16.mxu1 %v2824_v26  ;;  %v2815_v26 = vld [vmem:[#allocation8 + $0x8] sm:$0xff]  }
 0x261   :  { %2489 = vmatpush3.bf16.msra.mxu1 %v2825_v29  ;;  %v2816_v29 = vld [vmem:[#allocation8 + $0x40] sm:$0xff]  }
 0x262   :  { %2490 = vmatprep.subr.bf16.mxu1 %v2826_v30  ;;  %v2817_v30 = vld [vmem:[#allocation8] sm:$0xff]  }
 0x265   :  { %2491 = vmatpush3.bf16.msra.mxu1 %v2827_v31 }
 0x266   :  { %2492 = vmatprep.subr.bf16.mxu1 %v2828_v33  ;;  %v1362_v33 = vsub.s32 3, %v3048_v17 }
 0x269   :  { %2493 = vmatpush3.bf16.msra.mxu1 %v2829_v34 }
 0x26a   :  { %2494 = vmatprep.subr.bf16.mxu1 %v2830_v35  ;;  %v1358_v35 = vsub.s32 2, %v3048_v17 }
 0x26d   :  { %2495 = vmatpush3.bf16.msra.mxu1 %v2831_v36 }
 0x26e   :  { %2496 = vmatprep.subr.bf16.mxu1 %v2832_v38 }
 0x271   :  { %2497 = vmatpush3.bf16.msra.mxu1 %v2833_v39 }
 0x272   :  { %2526 = vmatprep.subr.bf16.mxu1 %v2834_v40 }
 0x2d4   :  { %v1286_v41 = vpop.f32.mrf.mxu0 }
 0x2d5   :  { %v1287_v5 = vadd.f32 %v1286_v41, %v3104_v54  ;;  %v1351_v54 = vrot.slane %v3156_v45, %v1350_v43  ;;  %v1363_v41 = vrot.slane %v3156_v45, %v1362_v33 }
 0x2d6   :  { %v1288_v6 = vpop.f32.mrf.mxu0 }
 0x2d7   :  { %v1289_v46 = vadd.f32 %v1288_v6, %v3098_v12  ;;  %v1338_v55 = vmul.f32 %v3092_v47, %v1287_v5 }
 0x2d8   :  { %v1290_v48 = vpop.f32.mrf.mxu0 }
 0x2d9   :  { %v1339_v49 = vmul.f32 %v3092_v47, %v1289_v46  ;;  %v1291_v51 = vadd.f32 %v1290_v48, %v3095_v52  ;;  %v1368_v62 = vadd.f32 %v1351_v54, %v1338_v55 }
 0x2da   :  { %v1292_v56 = vpop.f32.mrf.mxu0 }
 0x2db   :  { %v1342_v57 = vmul.f32 %v3090_v44, %v1291_v51  ;;  %v1293_v58 = vadd.f32 %v1292_v56, %v3101_v53  ;;  %v1369_v59 = vadd.f32 %v1355_v50, %v1339_v49  ;;  %v1376_v4 = vmax.f32 %v1368_v62, 0.0  ;;  %v2806_v53 = vld [vmem:[#allocation8 + $0x68] sm:$0xff]   ;;  %v2843_v62 = vld [vmem:[#allocation8 + $0x98] sm:$0xff]  }
 0x2dd   :  { %v1372_v60 = vadd.f32 %v1351_v54, %v1342_v57  ;;  %v1343_v12 = vmul.f32 %v3090_v44, %v1293_v58  ;;  %v1377_v2 = vmax.f32 %v1369_v59, 0.0  ;;  %v2835_v57 = vld [vmem:[#allocation8 + $0xb8] sm:$0xff]   ;;  %v2836_v58 = vld [vmem:[#allocation8 + $0xf0] sm:$0xff]   ;;  %v2839_v59 = vld [vmem:[#allocation8 + $0xa8] sm:$0xff]  }
 0x2df   :  { %v1373_v63 = vadd.f32 %v1355_v50, %v1343_v12  ;;  %v1380_v1 = vmax.f32 %v1372_v60, 0.0  ;;  %v2841_v60 = vld [vmem:[#allocation8 + $0xa0] sm:$0xff]   ;;  %v2842_v12 = vld [vmem:[#allocation8 + $0xd8] sm:$0xff]  }
 0x2e1   :  { %v1381_v3 = vmax.f32 %v1373_v63, 0.0  ;;  %v1384_v9 = vpack.c.bf16 %v1380_v1, %v1376_v4  ;;  %v2844_v63 = vld [vmem:[#allocation8 + $0xd0] sm:$0xff]   ;;  %v2848_v4 = vld [vmem:[#allocation8 + $0xc0] sm:$0xff]  }
 0x2e2   :  { %v2845_v1 = vld [vmem:[#allocation8 + $0x90] sm:$0xff]  }
 0x2e3   :  { %v1385_v52 = vpack.c.bf16 %v1381_v3, %v1377_v2  ;;  %v2846_v2 = vld [vmem:[#allocation8 + $0xc8] sm:$0xff]  }
 0x2e4   :  { %v2847_v3 = vld [vmem:[#allocation8 + $0x88] sm:$0xff]  }
 0x2e5   :  { %1676 = vmatprep.mubr.bf16.mxu0 %v1385_v52 }
 0x2e6   :  { %1677 = vmatmul.mubr.bf16.vlgmr.msra.gmra.mxu0 %v1384_v9 }
 0x2e7   :  { %2505 = vmatpush3.bf16.msra.mxu0 %v2803_v7  ;;  %2059 = vmatprep.mubr.bf16.mxu0 %v1385_v52  ;;  %v2849_v52 = vld [vmem:[#allocation8 + $0x80] sm:$0xff]   ;;  %v2953_v7 = vmov 1  }
 0x2e8   :  { %2506 = vmatprep.subr.bf16.mxu0 %v2804_v10  ;;  %2587 = vset.pattern.permute.xlu0 %v2953_v7 }
 0x2eb   :  { %2507 = vmatpush3.bf16.msra.mxu0 %v2805_v11 }
 0x2ec   :  { %2508 = vmatprep.subr.bf16.mxu0 %v2806_v53 }
 0x2ef   :  { %2509 = vmatpush3.bf16.msra.mxu0 %v2807_v13 }
 0x2f0   :  { %2510 = vmatprep.subr.bf16.mxu0 %v2808_v14 }
 0x2f3   :  { %2511 = vmatpush3.bf16.msra.mxu0 %v2809_v15 }
 0x2f4   :  { %2512 = vmatprep.subr.bf16.mxu0 %v2810_v37 }
 0x2f7   :  { %2513 = vmatpush3.bf16.msra.mxu0 %v2811_v16 }
 0x2f8   :  { %2514 = vmatprep.subr.bf16.mxu0 %v2812_v23 }
 0x2fb   :  { %2515 = vmatpush3.bf16.msra.mxu0 %v2813_v24 }
 0x2fc   :  { %2516 = vmatprep.subr.bf16.mxu0 %v2814_v25 }
 0x2ff   :  { %2517 = vmatpush3.bf16.msra.mxu0 %v2815_v26 }
 0x300   :  { %2518 = vmatprep.subr.bf16.mxu0 %v2816_v29 }
 0x303   :  { %2519 = vmatpush3.bf16.msra.mxu0 %v2817_v30 }
 0x306   :  { %2060 = vmatmul.mubr.bf16.vlgmr.msra.gmra.mxu0 %v1384_v9 }
 0x307   :  { %2556 = vmatprep.mubr.msk.bf16.mxu0 %vm1127_vm5, %v3112_v61  ;;  %v1359_v61 = vrot.slane %v3156_v45, %v1358_v35  ;;  %v2837_v45 = vld [vmem:[#allocation8 + $0xb0] sm:$0xff]  }
 0x314   :  { %v1329_v31 = vpop.f32.mrf.mxu1 }
 0x315   :  { %v1330_v34 = vadd.f32 %v1329_v31, %v3134_v22  ;;  %v2252_v31 = vld [vmem:[%s3214_s0] ss:$0 sm:$0xff] }
 0x316   :  { %v1331_v36 = vpop.f32.mrf.mxu1  ;;  %vm106_vm8 = vcmp.eq.s32.totalorder %v3048_v17, %v2252_v31  ;;  %vm107_vm9 = vcmp.eq.s32.totalorder %v3051_v20, %v2252_v31 }
 0x317   :  { %v1332_v38 = vadd.f32 %v1331_v36, %v3128_v19  ;;  %v1340_v5 = vmul.f32 %v3092_v47, %v1330_v34  ;;  %v108_v34 = vsel %vm106_vm8, 1.0, %v2952_v27  ;;  %v109_v35 = vsel %vm107_vm9, 1.0, %v2952_v27 }
 0x318   :  { %v1333_v39 = vpop.f32.mrf.mxu1 }
 0x319   :  { %v1341_v40 = vmul.f32 %v3092_v47, %v1332_v38  ;;  %v1334_v42 = vadd.f32 %v1333_v39, %v3125_v18  ;;  %v1370_v49 = vadd.f32 %v1359_v61, %v1340_v5 }
 0x31a   :  { %v1335_v43 = vpop.f32.mrf.mxu1 }
 0x31b   :  { %v1344_v6 = vmul.f32 %v3090_v44, %v1334_v42  ;;  %v1336_v22 = vadd.f32 %v1335_v43, %v3131_v21  ;;  %v1371_v46 = vadd.f32 %v1363_v41, %v1341_v40  ;;  %v1378_v56 = vmax.f32 %v1370_v49, 0.0  ;;  %v2838_v21 = vld [vmem:[#allocation8 + $0xe8] sm:$0xff]  }
 0x31d   :  { %v1374_v48 = vadd.f32 %v1359_v61, %v1344_v6  ;;  %v1345_v19 = vmul.f32 %v3090_v44, %v1336_v22  ;;  %v1379_v55 = vmax.f32 %v1371_v46, 0.0  ;;  %v2840_v44 = vld [vmem:[#allocation8 + $0xe0] sm:$0xff]  }
 0x31f   :  { %v1375_v50 = vadd.f32 %v1363_v41, %v1345_v19  ;;  %v1382_v51 = vmax.f32 %v1374_v48, 0.0 }
 0x321   :  { %v1383_v54 = vmax.f32 %v1375_v50, 0.0  ;;  %v1386_v47 = vpack.c.bf16 %v1382_v51, %v1378_v56 }
 0x323   :  { %v1387_v18 = vpack.c.bf16 %v1383_v54, %v1379_v55 }
 0x325   :  { %1717 = vmatprep.mubr.bf16.mxu1 %v1387_v18 }
 0x326   :  { %1718 = vmatmul.mubr.bf16.vlgmr.msra.gmra.mxu1 %v1386_v47 }
 0x327   :  { %2527 = vmatpush3.bf16.msra.mxu1 %v2835_v57  ;;  %2100 = vmatprep.mubr.bf16.mxu1 %v1387_v18  ;;  %v1768_v57 = vstv %s3224_s10 }
 0x328   :  { %2528 = vmatprep.subr.bf16.mxu1 %v2836_v58 }
 0x32b   :  { %2529 = vmatpush3.bf16.msra.mxu1 %v2837_v45 }
 0x32c   :  { %2530 = vmatprep.subr.bf16.mxu1 %v2838_v21 }
 0x32f   :  { %2531 = vmatpush3.bf16.msra.mxu1 %v2839_v59 }
 0x330   :  { %2532 = vmatprep.subr.bf16.mxu1 %v2840_v44 }
 0x333   :  { %2533 = vmatpush3.bf16.msra.mxu1 %v2841_v60 }
 0x334   :  { %2534 = vmatprep.subr.bf16.mxu1 %v2842_v12 }
 0x337   :  { %2535 = vmatpush3.bf16.msra.mxu1 %v2843_v62 }
 0x338   :  { %2536 = vmatprep.subr.bf16.mxu1 %v2844_v63 }
 0x33b   :  { %2537 = vmatpush3.bf16.msra.mxu1 %v2845_v1 }
 0x33c   :  { %2538 = vmatprep.subr.bf16.mxu1 %v2846_v2 }
 0x33f   :  { %2539 = vmatpush3.bf16.msra.mxu1 %v2847_v3 }
 0x340   :  { %2540 = vmatprep.subr.bf16.mxu1 %v2848_v4 }
 0x343   :  { %2541 = vmatpush3.bf16.msra.mxu1 %v2849_v52 }
 0x344   :  { %2560 = vmatprep.subr.bf16.mxu1 %v2952_v27 }
 0x346   :  { %2101 = vmatmul.mubr.bf16.vlgmr.msra.gmra.mxu1 %v1386_v47 }
 0x347   :  { %2564 = vmatprep.mubr.msk.bf16.mxu1 %vm2954_vm10, %v2952_v27 }
 0x3a6   :  { %v2476_v9 = vpop.f32.mrf.mxu0 }
 0x3a8   :  { %v2477_v10 = vpop.f32.mrf.mxu0 }
 0x3a9   :  { %v2478_v13 = vadd.f32 %v2477_v10, %v2476_v9 }
 0x3aa   :  { %v2479_v16 = vpop.f32.mrf.mxu0 }
 0x3ac   :  { %v2480_v24 = vpop.f32.mrf.mxu0 }
 0x3ad   :  { %v2481_v26 = vadd.f32 %v2480_v24, %v2479_v16 }
 0x3c6   :  { %v2520_v63 = vpop.f32.mrf.mxu0 }
 0x3e6   :  { %v2498_v11 = vpop.f32.mrf.mxu1 }
 0x3e8   :  { %v2499_v53 = vpop.f32.mrf.mxu1 }
 0x3e9   :  { %v2500_v14 = vadd.f32 %v2499_v53, %v2498_v11 }
 0x3ea   :  { %v2501_v15 = vpop.f32.mrf.mxu1 }
 0x3eb   :  { %v1720_v37 = vadd.f32 %v2500_v14, %v2478_v13 }
 0x3ec   :  { %v2502_v23 = vpop.f32.mrf.mxu1 }
 0x3ed   :  { %1728 = vperm.xlu1 %2582, %v1720_v37   ;;  %v2503_v25 = vadd.f32 %v2502_v23, %v2501_v15 }
 0x3ef   :  { %v1723_v29 = vadd.f32 %v2503_v25, %v2481_v26 }
 0x3f1   :  { %2584 = vset.pattern.permute.xlu1 %v2953_v7 }
 0x3f2   :  { %1748 = vperm.xlu1 %2584, %v1720_v37  }
 0x3f6   :  { %2585 = vset.pattern.permute.xlu1 %v2951_v8 }
 0x3f7   :  { %1733 = vperm.xlu1 %2585, %v1723_v29  }
 0x3fb   :  { %2586 = vset.pattern.permute.xlu1 %v2953_v7  ;;  %v2521_v7 = vpop.f32.mrf.mxu0 }
 0x3fc   :  { %1752 = vperm.xlu1 %2586, %v1723_v29   ;;  %v2522_v14 = vadd.f32 %v2521_v7, %v2520_v63 }
 0x406   :  { %v2542_v62 = vpop.f32.mrf.mxu1 }
 0x408   :  { %v2543_v1 = vpop.f32.mrf.mxu1 }
 0x409   :  { %v2544_v53 = vadd.f32 %v2543_v1, %v2542_v62 }
 0x40a   :  { %v2545_v9 = vpop.f32.mrf.mxu1 }
 0x40b   :  { %v2103_v16 = vadd.f32 %v2544_v53, %v2522_v14 }
 0x468   :  { %v1729_v30 = vpop.permute.xlu1 %1728 }
 0x469   :  { %v1736_v36 = vmul.f32 %v1729_v30, %v108_v34 }
 0x46b   :  { %v1738_v39 = vsel %vm1104_vm1, %v1736_v36, 0.0 }
 0x46d   :  { %v1749_v33 = vpop.permute.xlu1 %1748 }
 0x46e   :  { %v1755_v41 = vmul.f32 %v1749_v33, %v3062_v28 }
 0x470   :  { %v1757_v20 = vsel %vm1104_vm1, %v1755_v41, 0.0 }
 0x472   :  { %v1734_v38 = vpop.permute.xlu1 %1733 }
 0x473   :  { %v1737_v8 = vmul.f32 %v1734_v38, %v109_v35 }
 0x475   :  { %v1739_v40 = vsel %vm1104_vm1, %v1737_v8, 0.0 }
 0x476   :  { %v1740_v42 = vadd.f32 %v1739_v40, %v1738_v39 }
 0x477   :  { %v1753_v5 = vpop.permute.xlu1 %1752 }
 0x478   :  { %v1741_v61 = vrot.slane %v1740_v42, 4  ;;  %v1756_v17 = vmul.f32 %v1753_v5, %v3066_v32 }
 0x47a   :  { %v1742_v43 = vadd.f32 %v1741_v61, %v1740_v42  ;;  %v1758_v6 = vsel %vm1104_vm1, %v1756_v17, 0.0 }
 0x47b   :  { %v1759_v22 = vadd.f32 %v1758_v6, %v1757_v20 }
 0x47c   :  { %v1743_v46 = vrot.slane %v1742_v43, 2 }
 0x47d   :  { %v1760_v48 = vrot.slane %v1759_v22, 4 }
 0x47e   :  { %v1744_v19 = vadd.f32 %v1743_v46, %v1742_v43 }
 0x47f   :  { %v1761_v49 = vadd.f32 %v1760_v48, %v1759_v22 }
 0x480   :  { %v1745_v51 = vrot.slane %v1744_v19, 1 }
 0x481   :  { %v1762_v50 = vrot.slane %v1761_v49, 2 }
 0x482   :  { %v1746_v56 = vadd.f32 %v1745_v51, %v1744_v19 }
 0x483   :  { %v1763_v55 = vadd.f32 %v1762_v50, %v1761_v49 }
 0x485   :  { %v1764_v54 = vrot.slane %v1763_v55, 1 }
 0x487   :  { %v1765_v18 = vadd.f32 %v1764_v54, %v1763_v55 }
 0x489   :  { %v1766_v47 = vadd.f32 %v1765_v18, %v1746_v56 }
 0x48b   :  { %v1769_v58 = vadd.f32 %v1768_v57, %v1766_v47 }
 0x48d   :  { %v1770_v45 = vmax.f32 %v1769_v58, 0.0 }
 0x48f   :  { %v2110_v21 = vmul.f32 %v1770_v45, %v3066_v32  ;;  %v2109_v59 = vmul.f32 %v1770_v45, %v3062_v28  ;;  %v2523_v32 = vpop.f32.mrf.mxu0  ;;  %v2546_v28 = vpop.f32.mrf.mxu1 }
 0x490   :  { %v2547_v11 = vadd.f32 %v2546_v28, %v2545_v9 }
 0x491   :  { %v2114_v44 = vsel %vm1104_vm1, %v2110_v21, 0.0  ;;  %v2111_v60 = vsel %vm1104_vm1, %v2109_v59, 0.0  ;;  %v2173_v12 = vpack.c.bf16 %v2110_v21, %v2109_v59  ;;  %v2524_v10 = vpop.f32.mrf.mxu0 }
 0x492   :  { %2115 = vadd.xlane.f32.xlu0 %v2114_v44  ;;  %2112 = vadd.xlane.f32.xlu1 %v2111_v60  ;;  %v2525_v13 = vadd.f32 %v2524_v10, %v2523_v32 }
 0x494   :  { %v2106_v15 = vadd.f32 %v2547_v11, %v2525_v13 }
 0x51b   :  { %v2116_v2 = vpop.xlane.xlu0 %2115  ;;  %v2113_v3 = vpop.xlane.xlu1 %2112 }
 0x51c   :  { %v2118_v4 = vadd.f32 1.0, %v2116_v2  ;;  %v2117_v52 = vadd.f32 1.0, %v2113_v3 }
 0x51e   :  { %2854 = vrsqrt.f32 %v2118_v4 }
 0x51f   :  { %2856 = vrsqrt.f32 %v2117_v52 }
 0x52b   :  { %v2855_v37 = vpop.eup %2854 }
 0x52c   :  { %v2857_v23 = vpop.eup %2856  ;;  %v2122_v24 = vmul.f32 %v2855_v37, %v2106_v15 }
 0x52d   :  { %v2121_v25 = vmul.f32 %v2857_v23, %v2103_v16 }
 0x52f   :  { %v2123_v26 = vpack.c.bf16 %v2122_v24, %v2121_v25 }
 0x531   :  { %2554 = vmatprep.subr.bf16.mxu0 %v2123_v26 }
 0x532   :  { %2555 = vmatpush3.bf16.msra.mxu0 %v2123_v26 }
 0x535   :  { %2557 = vmatmul.mubr.msk.bf16.vlgmr.msra.gmra.mxu0 %vm1127_vm5, %v3119_v0  ;;  %v2459_v0 = vld [vmem:[%s3223_s9] ss:$0 sm:$0xff] }
 0x5f5   :  { %v2558_v29 = vpop.f32.mrf.mxu0 }
 0x5f7   :  { %v2158_v30 = vpop.f32.mrf.mxu0 }
 0x5f9   :  { %v2559_v31 = vpop.f32.mrf.mxu0 }
 0x5fa   :  { %v2175_v33 = vpack.c.bf16 %v2559_v31, %v2558_v29 }
 0x5fb   :  { %v2161_v34 = vpop.f32.mrf.mxu0 }
 0x5fc   :  { %2561 = vmatpush3.bf16.msra.mxu1 %v2175_v33  ;;  %v2174_v35 = vpack.c.bf16 %v2161_v34, %v2158_v30 }
 0x5fd   :  { %2562 = vmatprep.subr.bf16.mxu1 %v2952_v27 }
 0x600   :  { %2563 = vmatpush3.bf16.msra.mxu1 %v2174_v35 }
 0x603   :  { %2565 = vmatmul.mubr.msk.bf16.vlgmr.msra.gmra.mxu1 %vm1104_vm1, %v2173_v12 }
 0x6c3   :  { %v2213_v36 = vpop.f32.mrf.mxu1 }
 0x6c4   :  { %v2214_v38 = vadd.f32 %v2213_v36, %v2121_v25 }
 0x6c5   :  { %v2566_v8 = vpop.f32.mrf.mxu1 }
 0x6c6   :  { %v2220_v39 = vmul.f32 %v2857_v23, %v2214_v38 }
 0x6c7   :  { %v2216_v40 = vpop.f32.mrf.mxu1 }
 0x6c8   :  { %v2229_v41 = vadd.f32 %v2459_v0, %v2220_v39  ;;  %v2217_v42 = vadd.f32 %v2216_v40, %v2122_v24 }
 0x6c9   :  { %v2567_v5 = vpop.f32.mrf.mxu1 }
 0x6ca   :  { %2231 = vst [vmem:[#allocation9] sm:$0xff] %v2229_v41  ;;  %v2221_v27 = vmul.f32 %v2855_v37, %v2217_v42 }
 0x6cc   :  { %v2230_v61 = vadd.f32 %v2459_v0, %v2221_v27 }
 0x6ce   :  { %2232 = vst [vmem:[#allocation9 + $0x8] sm:$0xff] %v2230_v61 }
 0x6cf   :  { %2929 = shalt.err (!%p2926_p5)
}
 0x6d0   :  { %s2956_s9 = smov 128   ;;  %s2957_s16 = smov 8  }
 0x6d1   :  { %2244 = dma.vmem_to_hbm [thread:$0]  %s2239_s5, 256, %s3225_s11, [#allocation5], %s2956_s9, %s2956_s9, %s2957_s16  }
 0x6d2   :  { %2942 = dma.done.wait [#allocation5], 256  }
 0x6d3   :  { %2943 = vsyncadd [#allocation5], 4294967040 }
 0x6d4   :  { %2248 = vsyncpa [#allocation4], 1 }
 0x6d5   :  { %2249 = vsyncpa [#allocation7], 1 }
 0x6d6   :  { %2250 = vsyncpa [#allocation5], 1 }

</bundles_post_ra>
